<compile_context>
chip_gen: v6e
topology: v6e:2x2x1
jax: 0.10.0
libtpu: 0.0.40
codegen_flags: <defaults>
</compile_context>

<pallas_src>
import functools
import math

import numpy as np
import jax
import jax.numpy as jnp
from jax.experimental import pallas as pl
from jax.experimental.pallas import tpu as pltpu


# --------------------------------------------------------------------------------------
# Filter / hyper-parameter construction (mirrors the PyTorch module's __init__ exactly).
# --------------------------------------------------------------------------------------
def _kaiser_attenuation(n_taps, f_h, sr):
    df = 2 * f_h / (sr / 2)
    return 2.285 * (n_taps - 1) * math.pi * df + 7.95


def _kaiser_beta(n_taps, f_h, sr):
    atten = _kaiser_attenuation(n_taps, f_h, sr)
    if atten > 50:
        return 0.1102 * (atten - 8.7)
    elif 50 >= atten >= 21:
        return 0.5842 * (atten - 21) ** 0.4 + 0.07886 * (atten - 21)
    else:
        return 0.0


def _kaiser_window(n_taps, f_h, sr):
    beta = _kaiser_beta(n_taps, f_h, sr)
    ind = np.arange(n_taps) - (n_taps - 1) / 2
    return np.i0(beta * np.sqrt(1 - (2 * ind / (n_taps - 1)) ** 2)) / np.i0(beta)


def _lowpass_filter(n_taps, cutoff, band_half, sr):
    window = _kaiser_window(n_taps, band_half, sr)
    ind = np.arange(n_taps) - (n_taps - 1) / 2
    return 2 * cutoff / sr * np.sinc(2 * cutoff / sr * ind) * window


def alias_level_params(level, max_levels, max_size, max_channels,
                       start_cutoff=2, critical_layers=2, base_channels=2 ** 14):
    end_cutoff = max_size // 2
    cutoff = start_cutoff * (end_cutoff / start_cutoff) ** min(level / (max_levels - critical_layers), 1)
    start_stopband = start_cutoff ** 2.1
    end_stopband = end_cutoff * 2 ** 0.3
    stopband = start_stopband * (end_stopband / start_stopband) ** min(level / (max_levels - critical_layers), 1)
    size = 2 ** math.ceil(math.log(min(2 * stopband, max_size), 2))
    band_half = max(stopband, size / 2) - cutoff
    channels = min(round(base_channels / size), max_channels)
    return cutoff, stopband, band_half, channels, size


# --------------------------------------------------------------------------------------
# 1-D upfirdn reference (numpy, f64) — builds the dense operator matrices and serves as
# the correctness reference (zero-insert upsample, zero-pad, true convolution, decimate).
# --------------------------------------------------------------------------------------
def upfirdn1d_np(x, k, up, down, pad0, pad1):
    x = np.asarray(x, dtype=np.float64)
    k = np.asarray(k, dtype=np.float64)
    N = x.shape[-1]
    K = k.shape[0]
    xu = np.zeros(x.shape[:-1] + (N * up,), dtype=np.float64)
    xu[..., ::up] = x
    zpre = np.zeros(x.shape[:-1] + (pad0,), dtype=np.float64)
    zpost = np.zeros(x.shape[:-1] + (pad1,), dtype=np.float64)
    xp = np.concatenate([zpre, xu, zpost], axis=-1)
    L = xp.shape[-1]
    out_len = L - K + 1
    kf = k[::-1]
    out = np.zeros(x.shape[:-1] + (out_len,), dtype=np.float64)
    for t in range(out_len):
        out[..., t] = np.sum(xp[..., t:t + K] * kf, axis=-1)
    return out[..., ::down]


def upfirdn1d_matrix(n_in, k, up, down, pad0, pad1):
    """Dense operator M (n_out, n_in) s.t. out = M @ x for the 1-D upfirdn above."""
    resp = upfirdn1d_np(np.eye(n_in), k, up, down, pad0, pad1)  # (n_in, n_out)
    return resp.T.astype(np.float32)                            # (n_out, n_in)


def _round_up(v, m):
    return ((v + m - 1) // m) * m


_MiB = 1 << 20


def _hw_plan():
    """Generation-aware VMEM plan: (vmem_limit_bytes, per-step VMEM budget, two TensorCores)."""
    kind = ""
    try:
        kind = jax.devices()[0].device_kind.lower()
    except Exception:
        pass
    if "v7" in kind or "7x" in kind:
        limit, two_tc = 48 * _MiB, True       # 64 MiB physical VMEM per TC -> leave headroom
    elif "v6" in kind:
        limit, two_tc = 64 * _MiB, False      # 128 MiB physical; raise well past the 32 MiB scoped default
    else:
        limit, two_tc = 32 * _MiB, False      # v5e / unknown: conservative (16 MiB scoped default)
    try:
        phys = int(getattr(pltpu.get_tpu_info(), "vmem_capacity_bytes", 0))
        if phys > 0:
            limit = min(limit, phys * 3 // 4)
    except Exception:
        pass
    return limit, limit * 6 // 10, two_tc


def _choose_tb(BC, H, est_vmem, budget_bytes, two_tc, forced=None):
    """Per-grid-step batch TB: target M = TB*H ~ 1024 MXU rows, stay under the VMEM budget,
    enforce >= 2 grid steps only on 2-TensorCore parts (v7x), and snap to a divisor of BC so
    the wrapper never needs a jnp.pad copy in the common case."""
    if forced is not None:
        return max(1, min(int(forced), BC))
    tb = max(1, min(BC, max(1, 1024 // max(H, 1)), 128))
    while tb > 1 and est_vmem(tb) > budget_bytes:
        tb -= 1
    if two_tc and BC >= 2:
        tb = min(tb, max(1, (BC + 1) // 2))    # >= 2 steps so both TensorCores get work
    tb_div = max(dv for dv in range(1, tb + 1) if BC % dv == 0)
    if tb_div * 2 >= tb:                       # a divisor avoids the wrapper-side pad copy
        tb = tb_div
    return tb


# --------------------------------------------------------------------------------------
# Pallas kernel.  Per grid step: TB (n, c) slices.  4 plain 2-D MXU matmuls (bf16 operands,
# f32 accumulation) + one f32 elementwise activation; the H-axis filters are applied in a
# transposed (H-last) layout reached via two minor-dim XLU transposes with 8-aligned reshapes.
# --------------------------------------------------------------------------------------
def _alias_free_act_kernel(x_ref, uwT_ref, uhT_ref, dhT_ref, dwT_ref, o_ref, *,
                           activation, compute_dtype):
    TB, H, W = x_ref.shape
    Wu_128 = uwT_ref.shape[1]          # matmul-1 N (lane) dim, 128-multiple (free padding)
    Hu_p = uhT_ref.shape[1]            # matmul-2 N / matmul-3 K dim, 128-multiple
    Hd_p = dhT_ref.shape[1]            # matmul-3 N dim, 8-multiple (becomes a sublane dim)
    Wu_8, Wd_p = dwT_ref.shape         # middle M rows (8-multiple, NOT 128-padded) / output lanes
    Hd_c = o_ref.shape[1]              # unpadded output rows
    cd = compute_dtype

    # In-kernel cast of the input tile (VPU op hidden under the MXU) — no extra HBM pass over x.
    x = x_ref[...].astype(cd)

    # ---- matmul 1: upsample along W.  (TB*H, W) @ (W, Wu_128) ----
    y = jnp.dot(x.reshape(TB * H, W), uwT_ref[...],
                preferred_element_type=jnp.float32)                       # f32 (TB*H, Wu_128)

    # Drop the 128-lane padding BEFORE it becomes the (expensive) M dim of the middle matmuls;
    # keep only the 8-aligned Wu_8 rows.  (Zero UwT columns -> zero rows; anything act(0)-shaped
    # they produce later is killed by the zero rows of DwT.)
    y = y.reshape(TB, H, Wu_128)
    if Wu_8 != Wu_128:
        y = y[:, :, :Wu_8]
    y = jnp.swapaxes(y, 1, 2).reshape(TB * Wu_8, H)                       # H-last layout

    # ---- matmul 2: upsample along H ----
    y = jnp.dot(y.astype(cd), uhT_ref[...],
                preferred_element_type=jnp.float32)                       # (TB*Wu_8, Hu_p)

    # ---- activation (always f32) ----
    y = activation(y)

    # ---- matmul 3: downsample along H (margin crop + padding folded into dhT) ----
    y = jnp.dot(y.astype(cd), dhT_ref[...],
                preferred_element_type=jnp.float32)                       # (TB*Wu_8, Hd_p)

    # ---- back to W-last layout ----
    y = jnp.swapaxes(y.reshape(TB, Wu_8, Hd_p), 1, 2).reshape(TB * Hd_p, Wu_8)

    # ---- matmul 4: downsample along W (margin crop + lane padding folded into dwT) ----
    y = jnp.dot(y.astype(cd), dwT_ref[...],
                preferred_element_type=jnp.float32)                       # (TB*Hd_p, Wd_p)

    y = y.reshape(TB, Hd_p, Wd_p)
    if Hd_c != Hd_p:
        y = y[:, :Hd_c, :]            # don't write the padded sublane rows back to HBM
    o_ref[...] = y.astype(o_ref.dtype)


class AliasFreeActivationPallas:
    def __init__(self, level, max_levels, max_size, max_channels, margin,
                 start_cutoff=2, critical_layers=2, window_size=6,
                 activation=None, negative_slope=0.2,
                 compute_dtype=jnp.bfloat16,     # bf16 MXU operands by default, f32 accumulation
                 out_dtype=jnp.float32,          # bf16 opt-in when downstream accepts it
                 block_batch=None):
        (self.cutoff, self.stopband, self.band_half,
         self.channels, self.size) = alias_level_params(
            level, max_levels, max_size, max_channels, start_cutoff, critical_layers)
        (self.cutoff_prev, self.stopband_prev, self.band_half_prev,
         self.channels_prev, self.size_prev) = alias_level_params(
            max(level - 1, 0), max_levels, max_size, max_channels, start_cutoff, critical_layers)

        self.scale_factor = 2 if self.size_prev < self.size else 1

        up_filter = _lowpass_filter(window_size * self.scale_factor * 2, self.cutoff_prev,
                                    self.band_half_prev, self.size * self.scale_factor * 2)
        self.up_filter = (up_filter / up_filter.sum() * 2 * self.scale_factor).astype(np.float64)
        down_filter = _lowpass_filter(window_size * self.scale_factor, self.cutoff,
                                      self.band_half, self.size * self.scale_factor * 2)
        self.down_filter = (down_filter / down_filter.sum()).astype(np.float64)

        p = self.up_filter.shape[0] - 2 * self.scale_factor
        self.up_pad = ((p + 1) // 2 + 2 * self.scale_factor - 1, p // 2)
        p = self.down_filter.shape[0] - 2
        self.down_pad = ((p + 1) // 2, p // 2)
        self.margin = margin
        self.up_factor = 2 * self.scale_factor
        self.down_factor = 2

        self.negative_slope = negative_slope
        # Any JAX-traceable elementwise fn works; default = leaky_relu(negative_slope).
        self.activation = activation or (lambda v: jnp.where(v >= 0, v, negative_slope * v))
        self.compute_dtype = compute_dtype
        self.out_dtype = out_dtype
        self.block_batch = block_batch
        self._cache = {}                 # (N, C, H, W, dtype) -> (jitted fn, weight arrays)

    # ----------------------- dense operator matrices (host side) -----------------------
    def _build_operators(self, H, W):
        Uh = upfirdn1d_matrix(H, self.up_filter, self.up_factor, 1, *self.up_pad)        # (Hu, H)
        Uw = upfirdn1d_matrix(W, self.up_filter, self.up_factor, 1, *self.up_pad)        # (Wu, W)
        Hu, Wu = Uh.shape[0], Uw.shape[0]
        Dh = upfirdn1d_matrix(Hu, self.down_filter, 1, self.down_factor, *self.down_pad)  # (Hd, Hu)
        Dw = upfirdn1d_matrix(Wu, self.down_filter, 1, self.down_factor, *self.down_pad)  # (Wd, Wu)
        Hd, Wd = Dh.shape[0], Dw.shape[0]

        # Fold the margin crop into the downsample operators (no cropped pixels computed).
        m = (self.scale_factor * self.margin // 2
             if (self.scale_factor > 1 and self.margin > 0) else 0)
        if m > 0:
            Dh = Dh[m:Hd - m]
            Dw = Dw[m:Wd - m]
        Hd_c, Wd_c = Dh.shape[0], Dw.shape[0]

        # Pad only where it is a (free) matmul-N/lane dim to 128; the dim that becomes the
        # middle M rows (Wu) and the dim that becomes output sublanes (Hd) only to 8.
        Wu_128 = _round_up(Wu, 128)   # matmul-1 N
        Wu_8 = _round_up(Wu, 8)       # middle M rows / matmul-4 K
        Hu_p = _round_up(Hu, 128)     # matmul-2 N / matmul-3 K
        Hd_p = _round_up(Hd_c, 8)     # matmul-3 N (becomes a sublane dim after the swap)
        Wd_p = _round_up(Wd_c, 128)   # matmul-4 N -> lane-dense output store

        UwT = np.zeros((W, Wu_128), np.float32); UwT[:, :Wu] = Uw.T
        UhT = np.zeros((H, Hu_p), np.float32);   UhT[:, :Hu] = Uh.T
        DhT = np.zeros((Hu_p, Hd_p), np.float32); DhT[:Hu, :Hd_c] = Dh.T
        DwT = np.zeros((Wu_8, Wd_p), np.float32); DwT[:Wu, :Wd_c] = Dw.T

        dims = dict(Wu_128=Wu_128, Wu_8=Wu_8, Hu_p=Hu_p,
                    Hd_c=Hd_c, Wd_c=Wd_c, Hd_p=Hd_p, Wd_p=Wd_p)
        return UwT, UhT, DhT, DwT, dims

    # -------------------- per-shape jitted callable (cached) --------------------
    def _build_callable(self, N, C, H, W, x_dtype):
        UwT, UhT, DhT, DwT, dims = self._build_operators(H, W)
        Wu_128, Wu_8, Hu_p = dims["Wu_128"], dims["Wu_8"], dims["Hu_p"]
        Hd_c, Wd_c, Hd_p, Wd_p = dims["Hd_c"], dims["Wd_c"], dims["Hd_p"], dims["Wd_p"]

        cd = self.compute_dtype
        out_dtype = self.out_dtype
        cd_bytes = jnp.dtype(cd).itemsize
        x_bytes = jnp.dtype(x_dtype).itemsize
        out_bytes = jnp.dtype(out_dtype).itemsize
        BC = N * C

        vmem_limit, vmem_budget, two_tc = _hw_plan()

        def est_vmem(tb):
            # Conservative per-step VMEM estimate: live intermediates + double-buffered
            # in/out blocks + double-buffered weights.
            m_mid = tb * Wu_8
            interm = (tb * H * Wu_128 * 4
                      + m_mid * Hu_p * (4 + cd_bytes)
                      + m_mid * Hd_p * (4 + cd_bytes)
                      + tb * Hd_p * Wu_8 * (4 + cd_bytes)
                      + tb * Hd_p * Wd_p * 4)
            io = 2 * tb * H * W * x_bytes + 2 * tb * Hd_c * Wd_p * out_bytes
            wts = 2 * (W * Wu_128 + H * Hu_p + Hu_p * Hd_p + Wu_8 * Wd_p) * cd_bytes
            return interm + io + wts

        tb = _choose_tb(BC, H, est_vmem, vmem_budget, two_tc, forced=self.block_batch)
        n_steps = -(-BC // tb)
        BCpad = n_steps * tb

        uwT = jnp.asarray(UwT, dtype=cd)
        uhT = jnp.asarray(UhT, dtype=cd)
        dhT = jnp.asarray(DhT, dtype=cd)
        dwT = jnp.asarray(DwT, dtype=cd)

        kernel = functools.partial(_alias_free_act_kernel,
                                   activation=self.activation, compute_dtype=cd)

        flops = 2 * BCpad * (H * W * Wu_128 + Wu_8 * H * Hu_p
                             + Wu_8 * Hu_p * Hd_p + Hd_p * Wu_8 * Wd_p)
        bytes_acc = (BCpad * H * W * x_bytes + BCpad * Hd_c * Wd_p * out_bytes
                     + (UwT.size + UhT.size + DhT.size + DwT.size) * cd_bytes)

        call = pl.pallas_call(
            kernel,
            out_shape=jax.ShapeDtypeStruct((BCpad, Hd_c, Wd_p), out_dtype),
            grid=(n_steps,),
            in_specs=[
                pl.BlockSpec((tb, H, W), lambda i: (i, 0, 0)),
                pl.BlockSpec((W, Wu_128), lambda i: (0, 0)),
                pl.BlockSpec((H, Hu_p), lambda i: (0, 0)),
                pl.BlockSpec((Hu_p, Hd_p), lambda i: (0, 0)),
                pl.BlockSpec((Wu_8, Wd_p), lambda i: (0, 0)),
            ],
            out_specs=pl.BlockSpec((tb, Hd_c, Wd_p), lambda i: (i, 0, 0)),
            compiler_params=pltpu.CompilerParams(
                dimension_semantics=("parallel",),
                vmem_limit_bytes=int(vmem_limit)),
            cost_estimate=pl.CostEstimate(flops=int(flops), transcendentals=0,
                                          bytes_accessed=int(bytes_acc)),
        )

        def fn(x, uwT, uhT, dhT, dwT):
            x3 = x.reshape(BC, H, W)          # native dtype; the cd cast happens in-kernel
            if BCpad != BC:                   # only when no usable divisor TB was found
                x3 = jnp.pad(x3, ((0, BCpad - BC), (0, 0), (0, 0)))
            out = call(x3, uwT, uhT, dhT, dwT)
            if BCpad != BC or Wd_p != Wd_c:
                out = out[:BC, :, :Wd_c]
            return out.reshape(N, C, Hd_c, Wd_c)

        return jax.jit(fn), (uwT, uhT, dhT, dwT)

    def __call__(self, x):
        # x: (N, C, H, W)
        N, C, H, W = x.shape
        key = (N, C, H, W, jnp.dtype(x.dtype).name)
        if key not in self._cache:
            self._cache[key] = self._build_callable(N, C, H, W, x.dtype)
        fn, weights = self._cache[key]
        return fn(x, *weights)

    # ---------------- numpy reference (direct upfirdn, float64, no matrices) ----------------
    def reference(self, x_np):
        y = upfirdn1d_np(x_np, self.up_filter, self.up_factor, 1, *self.up_pad)              # along W
        y = np.moveaxis(upfirdn1d_np(np.moveaxis(y, 2, -1), self.up_filter,
                                     self.up_factor, 1, *self.up_pad), -1, 2)                # along H
        y = np.where(y >= 0, y, self.negative_slope * y)                                     # leaky_relu
        y = upfirdn1d_np(y, self.down_filter, 1, self.down_factor, *self.down_pad)           # along W
        y = np.moveaxis(upfirdn1d_np(np.moveaxis(y, 2, -1), self.down_filter,
                                     1, self.down_factor, *self.down_pad), -1, 2)            # along H
        if self.scale_factor > 1 and self.margin > 0:
            m = self.scale_factor * self.margin // 2
            y = y[:, :, m:-m, m:-m]
        return y.astype(np.float32)


if __name__ == "__main__":
    # Small, deterministic example.  level=2 / max_levels=6 / max_size=64 gives
    # scale_factor=2 (4x internal upsample, 2x downsample, margin crop active).
    key = jax.random.PRNGKey(0)
    x = jax.random.normal(key, (2, 4, 16, 16), dtype=jnp.float32)

    # Default: bf16 MXU operands, f32 accumulation, f32 activation / output.
    mod_bf16 = AliasFreeActivationPallas(level=2, max_levels=6, max_size=64,
                                         max_channels=16, margin=2)
    out_bf16 = jax.block_until_ready(mod_bf16(x))

    # f32 opt-out path for a strict numerics check against the f64 reference.
    mod_f32 = AliasFreeActivationPallas(level=2, max_levels=6, max_size=64,
                                        max_channels=16, margin=2,
                                        compute_dtype=jnp.float32)
    out_f32 = jax.block_until_ready(mod_f32(x))

    ref = mod_f32.reference(np.asarray(x, dtype=np.float64))
    assert out_f32.shape == ref.shape, (out_f32.shape, ref.shape)
    assert out_bf16.shape == ref.shape, (out_bf16.shape, ref.shape)
    np.testing.assert_allclose(np.asarray(out_f32), ref, rtol=2e-3, atol=2e-3)
    np.testing.assert_allclose(np.asarray(out_bf16), ref, rtol=1e-1, atol=1e-1)

    print("KERNEL_OK")
</pallas_src>

<mosaic_0001>
module attributes {stable_mosaic.version = 11 : i64} {
  func.func @_alias_free_act_kernel(%arg0: i32, %arg1: memref<8x16x16xf32, #tpu.memory_space<vmem>>, %arg2: memref<16x128xbf16, #tpu.memory_space<vmem>>, %arg3: memref<16x128xbf16, #tpu.memory_space<vmem>>, %arg4: memref<128x32xbf16, #tpu.memory_space<vmem>>, %arg5: memref<64x128xbf16, #tpu.memory_space<vmem>>, %arg6: memref<8x28x128xf32, #tpu.memory_space<vmem>>) attributes {dimension_semantics = [#tpu.dimension_semantics<parallel>], iteration_bounds = array<i64: 1>, scalar_prefetch = 0 : i64, scratch_operands = 0 : i64, tpu.core_type = #tpu.core_type<tc>, window_params = [{transform_indices = @transform_0, window_bounds = array<i64: 8, 16, 16>}, {pipeline_mode = #tpu.pipeline_mode<synchronous>, transform_indices = @transform_1, window_bounds = array<i64: 16, 128>}, {pipeline_mode = #tpu.pipeline_mode<synchronous>, transform_indices = @transform_2, window_bounds = array<i64: 16, 128>}, {pipeline_mode = #tpu.pipeline_mode<synchronous>, transform_indices = @transform_3, window_bounds = array<i64: 128, 32>}, {pipeline_mode = #tpu.pipeline_mode<synchronous>, transform_indices = @transform_4, window_bounds = array<i64: 64, 128>}, {transform_indices = @transform_5, window_bounds = array<i64: 8, 28, 128>}]} {
    %c0 = arith.constant 0 : index
    %c0_0 = arith.constant 0 : index
    %c0_1 = arith.constant 0 : index
    %0 = vector.load %arg1[%c0, %c0_0, %c0_1] : memref<8x16x16xf32, #tpu.memory_space<vmem>>, vector<8x16x16xf32>
    %1 = arith.truncf %0 : vector<8x16x16xf32> to vector<8x16x16xbf16>
    %2 = vector.shape_cast %1 : vector<8x16x16xbf16> to vector<128x16xbf16>
    %c0_2 = arith.constant 0 : index
    %c0_3 = arith.constant 0 : index
    %3 = vector.load %arg2[%c0_2, %c0_3] : memref<16x128xbf16, #tpu.memory_space<vmem>>, vector<16x128xbf16>
    %cst = arith.constant dense<0.000000e+00> : vector<128x128xf32>
    %4 = tpu.matmul %2, %3, %cst {dimension_numbers = #tpu.dot_dimension_numbers<[1], [0], [0], [1], [0, 0, 1, 1], [], []>} : vector<128x16xbf16>, vector<16x128xbf16>, vector<128x128xf32> -> vector<128x128xf32>
    %5 = vector.shape_cast %4 : vector<128x128xf32> to vector<8x16x128xf32>
    %6 = vector.extract_strided_slice %5 {offsets = [0, 0, 0], sizes = [8, 16, 64], strides = [1, 1, 1]} : vector<8x16x128xf32> to vector<8x16x64xf32>
    %7 = tpu.transpose %6, [0, 2, 1] : vector<8x16x64xf32> -> vector<8x64x16xf32>
    %8 = vector.shape_cast %7 : vector<8x64x16xf32> to vector<512x16xf32>
    %9 = arith.truncf %8 : vector<512x16xf32> to vector<512x16xbf16>
    %c0_4 = arith.constant 0 : index
    %c0_5 = arith.constant 0 : index
    %10 = vector.load %arg3[%c0_4, %c0_5] : memref<16x128xbf16, #tpu.memory_space<vmem>>, vector<16x128xbf16>
    %cst_6 = arith.constant dense<0.000000e+00> : vector<512x128xf32>
    %11 = tpu.matmul %9, %10, %cst_6 {dimension_numbers = #tpu.dot_dimension_numbers<[1], [0], [0], [1], [0, 0, 1, 1], [], []>} : vector<512x16xbf16>, vector<16x128xbf16>, vector<512x128xf32> -> vector<512x128xf32>
    %cst_7 = arith.constant 0.000000e+00 : f32
    %12 = vector.broadcast %cst_7 : f32 to vector<512x128xf32>
    %13 = arith.cmpf oge, %11, %12 : vector<512x128xf32>
    %cst_8 = arith.constant 2.000000e-01 : f32
    %14 = vector.broadcast %cst_8 : f32 to vector<512x128xf32>
    %15 = arith.mulf %14, %11 : vector<512x128xf32>
    %16 = arith.select %13, %11, %15 : vector<512x128xi1>, vector<512x128xf32>
    %17 = arith.truncf %16 : vector<512x128xf32> to vector<512x128xbf16>
    %c0_9 = arith.constant 0 : index
    %c0_10 = arith.constant 0 : index
    %18 = vector.load %arg4[%c0_9, %c0_10] : memref<128x32xbf16, #tpu.memory_space<vmem>>, vector<128x32xbf16>
    %cst_11 = arith.constant dense<0.000000e+00> : vector<512x32xf32>
    %19 = tpu.matmul %17, %18, %cst_11 {dimension_numbers = #tpu.dot_dimension_numbers<[1], [0], [0], [1], [0, 0, 1, 1], [], []>} : vector<512x128xbf16>, vector<128x32xbf16>, vector<512x32xf32> -> vector<512x32xf32>
    %20 = vector.shape_cast %19 : vector<512x32xf32> to vector<8x64x32xf32>
    %21 = tpu.transpose %20, [0, 2, 1] : vector<8x64x32xf32> -> vector<8x32x64xf32>
    %22 = vector.shape_cast %21 : vector<8x32x64xf32> to vector<256x64xf32>
    %23 = arith.truncf %22 : vector<256x64xf32> to vector<256x64xbf16>
    %c0_12 = arith.constant 0 : index
    %c0_13 = arith.constant 0 : index
    %24 = vector.load %arg5[%c0_12, %c0_13] : memref<64x128xbf16, #tpu.memory_space<vmem>>, vector<64x128xbf16>
    %cst_14 = arith.constant dense<0.000000e+00> : vector<256x128xf32>
    %25 = tpu.matmul %23, %24, %cst_14 {dimension_numbers = #tpu.dot_dimension_numbers<[1], [0], [0], [1], [0, 0, 1, 1], [], []>} : vector<256x64xbf16>, vector<64x128xbf16>, vector<256x128xf32> -> vector<256x128xf32>
    %26 = vector.shape_cast %25 : vector<256x128xf32> to vector<8x32x128xf32>
    %27 = vector.extract_strided_slice %26 {offsets = [0, 0, 0], sizes = [8, 28, 128], strides = [1, 1, 1]} : vector<8x32x128xf32> to vector<8x28x128xf32>
    %c0_15 = arith.constant 0 : index
    %c0_16 = arith.constant 0 : index
    %c0_17 = arith.constant 0 : index
    %28 = vector.load %arg6[%c0_15, %c0_16, %c0_17] : memref<8x28x128xf32, #tpu.memory_space<vmem>>, vector<8x28x128xf32>
    tpu.vector_store %arg6[%c0_15, %c0_16, %c0_17], %27 {strides = array<i32>} : memref<8x28x128xf32, #tpu.memory_space<vmem>>, vector<8x28x128xf32>,
    return
  }
  func.func @transform_0(%arg0: i32) -> (i32, i32, i32) {
    %c0_i32 = arith.constant 0 : i32
    %c0_i32_0 = arith.constant 0 : i32
    %c0_i32_1 = arith.constant 0 : i32
    return %arg0, %c0_i32, %c0_i32_0 : i32, i32, i32
  }
  func.func @transform_1(%arg0: i32) -> (i32, i32) {
    %c0_i32 = arith.constant 0 : i32
    %c0_i32_0 = arith.constant 0 : i32
    %c0_i32_1 = arith.constant 0 : i32
    return %c0_i32, %c0_i32_0 : i32, i32
  }
  func.func @transform_2(%arg0: i32) -> (i32, i32) {
    %c0_i32 = arith.constant 0 : i32
    %c0_i32_0 = arith.constant 0 : i32
    %c0_i32_1 = arith.constant 0 : i32
    return %c0_i32, %c0_i32_0 : i32, i32
  }
  func.func @transform_3(%arg0: i32) -> (i32, i32) {
    %c0_i32 = arith.constant 0 : i32
    %c0_i32_0 = arith.constant 0 : i32
    %c0_i32_1 = arith.constant 0 : i32
    return %c0_i32, %c0_i32_0 : i32, i32
  }
  func.func @transform_4(%arg0: i32) -> (i32, i32) {
    %c0_i32 = arith.constant 0 : i32
    %c0_i32_0 = arith.constant 0 : i32
    %c0_i32_1 = arith.constant 0 : i32
    return %c0_i32, %c0_i32_0 : i32, i32
  }
  func.func @transform_5(%arg0: i32) -> (i32, i32, i32) {
    %c0_i32 = arith.constant 0 : i32
    %c0_i32_0 = arith.constant 0 : i32
    %c0_i32_1 = arith.constant 0 : i32
    return %arg0, %c0_i32, %c0_i32_0 : i32, i32, i32
  }
}

</mosaic_0001>

<bundles_post_ra>
// kernel: fn.1
= control target key start
LH: loop header
LB: loop body
LE: loop exit
PB: predicated region body
PF: predicated region fallthrough
CT: control target
= control target key end

     0   :  { %10 = vsyncpa [#allocation3], 0  ;;  %s2566_s18 = smov [#allocation2]   ;;  %s2844_s0 = inlined_call_operand.hbm [shape: f32[8,16,16], index: 0, kind: input, shape index: {}]   ;;  %s2845_s1 = inlined_call_operand.vmem [shape: bf16[16,128], index: 1, kind: input, shape index: {}]   ;;  %s2846_s2 = inlined_call_operand.vmem [shape: bf16[16,128], index: 2, kind: input, shape index: {}]   ;;  %s2847_s3 = inlined_call_operand.vmem [shape: bf16[128,32], index: 3, kind: input, shape index: {}]   ;;  %s2848_s4 = inlined_call_operand.vmem [shape: bf16[64,128], index: 4, kind: input, shape index: {}]   ;;  %s2849_s5 = inlined_call_operand.vmem [shape: f32[8,28,128], index: 5, kind: output, shape index: {}]  }
   0x1   :  { %s16_s19 = sshll.u32 %s2566_s18, 4  ;;  %s17_s19 = int_to_ptr.vmem [resolvable:$true] %s16_s19 }
   0x2   :  { %s2552_s20 = scalar_lea.vmem %s17_s19, 2048  ;;  %p2557_p1 = scmp.lt.s32.totalorder %s17_s19, %s17_s19 }
   0x3   :  { %p2553_p0 = scmp.ne.s32.totalorder %s17_s19, %s2552_s20  ;;  %p2558_p2 = scmp.lt.s32.totalorder %s2552_s20, %s2552_s20 }
   0x5   :  { %p2559_p3 = por %p2558_p2, %p2557_p1 }
   0x7   :  { %p2560_p4 = pnand %p2559_p3, %p2553_p0 }
   0x9   :  { %2563 = shalt.err (!%p2560_p4)
}
   0xa   :  { %s2567_s21 = smov 128   ;;  %s2568_s22 = smov 8  }
   0xb   :  { %22 = dma.hbm_to_vmem [thread:$0]  %s2844_s0, 2048, %s17_s19, [#allocation3], %s2567_s21, %s2567_s21, %s2568_s22  }
   0xc   :  { %2564 = dma.done.wait [#allocation3], 2048  }
   0xd   :  { %2565 = vsyncadd [#allocation3], 4294965248  ;;  %v2530_v0 = vld [vmem:[%s2845_s1] sm:$0xff]   ;;  %v36_v2 = vld [vmem:[#allocation2 + $0x8] sm:$0xff]  ;;  %vm67_vm0 = vcmask 130048  }
   0xe   :  { %v35_v1 = vld [vmem:[#allocation2] sm:$0xff]  ;;  %v37_v3 = vld [vmem:[#allocation2 + $0x10] sm:$0xff]  ;;  %2170 = vmatprep.subr.bf16.mxu0 %v2530_v0  ;;  %v38_v5 = vld [vmem:[#allocation2 + $0x18] sm:$0xff] }
   0xf   :  { %v51_v4 = vpack.c.bf16 %v36_v2, %v35_v1  ;;  %v39_v6 = vld [vmem:[#allocation2 + $0x20] sm:$0xff]  ;;  %v40_v7 = vld [vmem:[#allocation2 + $0x28] sm:$0xff]  ;;  %2171 = vmatpush3.bf16.msra.mxu0 %v2530_v0  ;;  %v52_v8 = vpack.c.bf16 %v38_v5, %v37_v3  ;;  %v41_v10 = vld [vmem:[#allocation2 + $0x30] sm:$0xff] }
  0x10   :  { %v53_v9 = vpack.c.bf16 %v40_v7, %v39_v6  ;;  %v42_v11 = vld [vmem:[#allocation2 + $0x38] sm:$0xff]  ;;  %v43_v12 = vld [vmem:[#allocation2 + $0x40] sm:$0xff]  ;;  %v44_v13 = vld [vmem:[#allocation2 + $0x48] sm:$0xff] }
  0x11   :  { %2172 = vmatprep.mubr.msk.bf16.mxu0 %vm67_vm0, %v51_v4  ;;  %v54_v14 = vpack.c.bf16 %v42_v11, %v41_v10  ;;  %v55_v15 = vpack.c.bf16 %v44_v13, %v43_v12  ;;  %v45_v16 = vld [vmem:[#allocation2 + $0x50] sm:$0xff]  ;;  %v46_v17 = vld [vmem:[#allocation2 + $0x58] sm:$0xff]  ;;  %v47_v18 = vld [vmem:[#allocation2 + $0x60] sm:$0xff] }
  0x12   :  { %2173 = vmatmul.mubr.msk.bf16.vlgmr.msra.gmra.mxu0 %vm67_vm0, %v52_v8  ;;  %v48_v19 = vld [vmem:[#allocation2 + $0x68] sm:$0xff]  ;;  %v56_v20 = vpack.c.bf16 %v46_v17, %v45_v16  ;;  %v49_v22 = vld [vmem:[#allocation2 + $0x70] sm:$0xff]  ;;  %v50_v23 = vld [vmem:[#allocation2 + $0x78] sm:$0xff] }
  0x13   :  { %2176 = vmatprep.mubr.msk.bf16.mxu0 %vm67_vm0, %v53_v9  ;;  %v57_v21 = vpack.c.bf16 %v48_v19, %v47_v18  ;;  %v58_v24 = vpack.c.bf16 %v50_v23, %v49_v22  ;;  %v2531_v29 = vld [vmem:[%s2846_s2] sm:$0xff]   ;;  %v2532_v53 = vld [vmem:[%s2847_s3 + $0x38] sm:$0xff]   ;;  %v2533_v54 = vld [vmem:[%s2847_s3 + $0x30] sm:$0xff]  }
  0x14   :  { %2188 = vmatprep.subr.bf16.mxu1 %v2531_v29  ;;  %2254 = vmatprep.subr.bf16.mxu0 %v2532_v53  ;;  %v2534_v57 = vld [vmem:[%s2847_s3 + $0x28] sm:$0xff]   ;;  %v2535_v61 = vld [vmem:[%s2847_s3 + $0x20] sm:$0xff]   ;;  %v2536_v0 = vld [vmem:[%s2847_s3 + $0x18] sm:$0xff]  }
  0x15   :  { %2189 = vmatpush3.bf16.msra.mxu1 %v2531_v29  ;;  %2255 = vmatpush3.bf16.msra.mxu0 %v2532_v53 }
  0x16   :  { %2256 = vmatprep.subr.bf16.mxu0 %v2533_v54 }
  0x19   :  { %2257 = vmatpush3.bf16.msra.mxu0 %v2533_v54 }
  0x1a   :  { %2177 = vmatmul.mubr.msk.bf16.gmra.mxu0 %vm67_vm0, %v54_v14  ;;  %2258 = vmatprep.subr.bf16.mxu0 %v2534_v57 }
  0x1b   :  { %2180 = vmatprep.mubr.msk.bf16.mxu0 %vm67_vm0, %v55_v15 }
  0x1d   :  { %2259 = vmatpush3.bf16.msra.mxu0 %v2534_v57 }
  0x1e   :  { %2260 = vmatprep.subr.bf16.mxu0 %v2535_v61 }
  0x21   :  { %2261 = vmatpush3.bf16.msra.mxu0 %v2535_v61 }
  0x22   :  { %2181 = vmatmul.mubr.msk.bf16.gmra.mxu0 %vm67_vm0, %v56_v20  ;;  %2262 = vmatprep.subr.bf16.mxu0 %v2536_v0 }
  0x23   :  { %2184 = vmatprep.mubr.msk.bf16.mxu0 %vm67_vm0, %v57_v21 }
  0x25   :  { %2263 = vmatpush3.bf16.msra.mxu0 %v2536_v0 }
  0x2a   :  { %2185 = vmatmul.mubr.msk.bf16.gmra.mxu0 %vm67_vm0, %v58_v24 }
  0xd2   :  { %v2174_v25 = vpop.f32.mrf.mxu0 }
  0xd3   :  { %221 = vxpose.xlu1.b32.start [1/2] (short) (narrow) %v2174_v25, 64 }
  0xd4   :  { %v126_v26 = vpop.f32.mrf.mxu0 }
  0xd5   :  { %189 = vxpose.xlu0.b32.start [1/2] (short) (narrow) %v126_v26, 64 }
  0xd6   :  { %v2175_v27 = vpop.f32.mrf.mxu0 }
  0xd7   :  { %222 = vxpose.xlu1.b32.end [2/2] (short) (narrow) %v2175_v27, 64 }
  0xd8   :  { %v129_v28 = vpop.f32.mrf.mxu0 }
  0xd9   :  { %190 = vxpose.xlu0.b32.end [2/2] (short) (narrow) %v129_v28, 64 }
  0xda   :  { %v2178_v30 = vpop.f32.mrf.mxu0 }
  0xdc   :  { %v142_v31 = vpop.f32.mrf.mxu0 }
  0xde   :  { %v2179_v32 = vpop.f32.mrf.mxu0 }
  0xe0   :  { %v145_v33 = vpop.f32.mrf.mxu0 }
  0xe2   :  { %v2182_v34 = vpop.f32.mrf.mxu0 }
  0xe4   :  { %v158_v35 = vpop.f32.mrf.mxu0 }
  0xe6   :  { %v2183_v36 = vpop.f32.mrf.mxu0 }
  0xe8   :  { %v161_v37 = vpop.f32.mrf.mxu0 }
  0xea   :  { %v2186_v38 = vpop.f32.mrf.mxu0 }
  0xec   :  { %v174_v39 = vpop.f32.mrf.mxu0 }
  0xee   :  { %v2187_v40 = vpop.f32.mrf.mxu0 }
  0xf0   :  { %285 = vxpose.xlu1.b32.start [1/2] (short) (narrow) %v2178_v30, 64  ;;  %v177_v41 = vpop.f32.mrf.mxu0 }
  0xf2   :  { %253 = vxpose.xlu0.b32.start [1/2] (short) (narrow) %v142_v31, 64 }
  0xf4   :  { %286 = vxpose.xlu1.b32.end [2/2] (short) (narrow) %v2179_v32, 64 }
  0xf6   :  { %254 = vxpose.xlu0.b32.end [2/2] (short) (narrow) %v145_v33, 64 }
 0x10d   :  { %349 = vxpose.xlu1.b32.start [1/2] (short) (narrow) %v2182_v34, 64 }
 0x10f   :  { %317 = vxpose.xlu0.b32.start [1/2] (short) (narrow) %v158_v35, 64 }
 0x111   :  { %350 = vxpose.xlu1.b32.end [2/2] (short) (narrow) %v2183_v36, 64 }
 0x113   :  { %318 = vxpose.xlu0.b32.end [2/2] (short) (narrow) %v161_v37, 64 }
 0x12a   :  { %413 = vxpose.xlu1.b32.start [1/2] (short) (narrow) %v2186_v38, 64 }
 0x12c   :  { %381 = vxpose.xlu0.b32.start [1/2] (short) (narrow) %v174_v39, 64 }
 0x12e   :  { %414 = vxpose.xlu1.b32.end [2/2] (short) (narrow) %v2187_v40, 64 }
 0x130   :  { %382 = vxpose.xlu0.b32.end [2/2] (short) (narrow) %v177_v41, 64  ;;  %v2537_v41 = vld [vmem:[%s2847_s3 + $0x10] sm:$0xff]  }
 0x131   :  { %2264 = vmatprep.subr.bf16.mxu0 %v2537_v41 }
 0x132   :  { %2265 = vmatpush3.bf16.msra.mxu0 %v2537_v41 }
 0x14f   :  { %v237_v42 = vpop.trf.xlu1 }
 0x151   :  { %v205_v43 = vpop.trf.xlu0 }
 0x153   :  { %v238_v44 = vpop.trf.xlu1 }
 0x154   :  { %v449_v3 = vpack.c.bf16 %v238_v44, %v237_v42  ;;  %v2538_v44 = vld [vmem:[%s2847_s3 + $0x8] sm:$0xff]  }
 0x155   :  { %v206_v45 = vpop.trf.xlu0  ;;  %2266 = vmatprep.subr.bf16.mxu0 %v2538_v44 }
 0x156   :  { %v445_v46 = vpack.c.bf16 %v206_v45, %v205_v43  ;;  %2267 = vmatpush3.bf16.msra.mxu0 %v2538_v44 }
 0x157   :  { %v239_v47 = vpop.trf.xlu1 }
 0x158   :  { %2190 = vmatprep.mubr.msk.bf16.mxu1 %vm67_vm0, %v445_v46 }
 0x159   :  { %v207_v48 = vpop.trf.xlu0 }
 0x15b   :  { %v240_v49 = vpop.trf.xlu1 }
 0x15c   :  { %v450_v8 = vpack.c.bf16 %v240_v49, %v239_v47  ;;  %v2539_v49 = vld [vmem:[%s2847_s3] sm:$0xff]  }
 0x15d   :  { %v208_v50 = vpop.trf.xlu0  ;;  %2268 = vmatprep.subr.bf16.mxu0 %v2539_v49 }
 0x15e   :  { %v446_v51 = vpack.c.bf16 %v208_v50, %v207_v48  ;;  %2269 = vmatpush3.bf16.msra.mxu0 %v2539_v49 }
 0x15f   :  { %v241_v52 = vpop.trf.xlu1 }
 0x160   :  { %2191 = vmatmul.mubr.msk.bf16.vlgmr.msra.gmra.mxu1 %vm67_vm0, %v446_v51 }
 0x161   :  { %v209_v55 = vpop.trf.xlu0 }
 0x163   :  { %v242_v56 = vpop.trf.xlu1 }
 0x164   :  { %v451_v9 = vpack.c.bf16 %v242_v56, %v241_v52 }
 0x165   :  { %v210_v58 = vpop.trf.xlu0 }
 0x166   :  { %v447_v59 = vpack.c.bf16 %v210_v58, %v209_v55 }
 0x167   :  { %v243_v60 = vpop.trf.xlu1 }
 0x168   :  { %2194 = vmatprep.mubr.msk.bf16.mxu1 %vm67_vm0, %v447_v59 }
 0x169   :  { %v211_v62 = vpop.trf.xlu0 }
 0x16b   :  { %v244_v63 = vpop.trf.xlu1 }
 0x16c   :  { %v452_v14 = vpack.c.bf16 %v244_v63, %v243_v60 }
 0x16d   :  { %v212_v1 = vpop.trf.xlu0 }
 0x16e   :  { %v448_v2 = vpack.c.bf16 %v212_v1, %v211_v62 }
 0x16f   :  { %v301_v4 = vpop.trf.xlu1 }
 0x170   :  { %2195 = vmatmul.mubr.msk.bf16.gmra.mxu1 %vm67_vm0, %v448_v2 }
 0x171   :  { %2198 = vmatprep.mubr.msk.bf16.mxu1 %vm67_vm0, %v449_v3  ;;  %v269_v5 = vpop.trf.xlu0 }
 0x173   :  { %v302_v6 = vpop.trf.xlu1 }
 0x174   :  { %v457_v27 = vpack.c.bf16 %v302_v6, %v301_v4 }
 0x175   :  { %v270_v7 = vpop.trf.xlu0 }
 0x176   :  { %v453_v15 = vpack.c.bf16 %v270_v7, %v269_v5 }
 0x177   :  { %v303_v10 = vpop.trf.xlu1 }
 0x178   :  { %2199 = vmatmul.mubr.msk.bf16.gmra.mxu1 %vm67_vm0, %v450_v8 }
 0x179   :  { %2202 = vmatprep.mubr.msk.bf16.mxu1 %vm67_vm0, %v451_v9  ;;  %v271_v11 = vpop.trf.xlu0 }
 0x17b   :  { %v304_v12 = vpop.trf.xlu1 }
 0x17c   :  { %v458_v32 = vpack.c.bf16 %v304_v12, %v303_v10 }
 0x17d   :  { %v272_v13 = vpop.trf.xlu0 }
 0x17e   :  { %v454_v20 = vpack.c.bf16 %v272_v13, %v271_v11 }
 0x17f   :  { %v305_v16 = vpop.trf.xlu1 }
 0x180   :  { %2203 = vmatmul.mubr.msk.bf16.gmra.mxu1 %vm67_vm0, %v452_v14 }
 0x181   :  { %2206 = vmatprep.mubr.msk.bf16.mxu1 %vm67_vm0, %v453_v15  ;;  %v273_v17 = vpop.trf.xlu0 }
 0x183   :  { %v306_v18 = vpop.trf.xlu1 }
 0x184   :  { %v459_v33 = vpack.c.bf16 %v306_v18, %v305_v16 }
 0x185   :  { %v274_v19 = vpop.trf.xlu0 }
 0x186   :  { %v455_v21 = vpack.c.bf16 %v274_v19, %v273_v17 }
 0x187   :  { %v307_v22 = vpop.trf.xlu1 }
 0x188   :  { %2207 = vmatmul.mubr.msk.bf16.gmra.mxu1 %vm67_vm0, %v454_v20 }
 0x189   :  { %2210 = vmatprep.mubr.msk.bf16.mxu1 %vm67_vm0, %v455_v21  ;;  %v275_v23 = vpop.trf.xlu0 }
 0x18b   :  { %v308_v24 = vpop.trf.xlu1 }
 0x18c   :  { %v460_v38 = vpack.c.bf16 %v308_v24, %v307_v22 }
 0x18d   :  { %v276_v25 = vpop.trf.xlu0 }
 0x18e   :  { %v456_v26 = vpack.c.bf16 %v276_v25, %v275_v23 }
 0x18f   :  { %v365_v28 = vpop.trf.xlu1 }
 0x190   :  { %2211 = vmatmul.mubr.msk.bf16.gmra.mxu1 %vm67_vm0, %v456_v26 }
 0x191   :  { %2214 = vmatprep.mubr.msk.bf16.mxu1 %vm67_vm0, %v457_v27  ;;  %v333_v29 = vpop.trf.xlu0 }
 0x193   :  { %v366_v30 = vpop.trf.xlu1 }
 0x194   :  { %v465_v54 = vpack.c.bf16 %v366_v30, %v365_v28 }
 0x195   :  { %v334_v31 = vpop.trf.xlu0 }
 0x196   :  { %v461_v39 = vpack.c.bf16 %v334_v31, %v333_v29 }
 0x197   :  { %v367_v34 = vpop.trf.xlu1 }
 0x198   :  { %2215 = vmatmul.mubr.msk.bf16.gmra.mxu1 %vm67_vm0, %v458_v32 }
 0x199   :  { %2218 = vmatprep.mubr.msk.bf16.mxu1 %vm67_vm0, %v459_v33  ;;  %v335_v35 = vpop.trf.xlu0 }
 0x19b   :  { %v368_v36 = vpop.trf.xlu1 }
 0x19c   :  { %v466_v59 = vpack.c.bf16 %v368_v36, %v367_v34 }
 0x19d   :  { %v336_v37 = vpop.trf.xlu0 }
 0x19e   :  { %v462_v46 = vpack.c.bf16 %v336_v37, %v335_v35 }
 0x19f   :  { %v369_v40 = vpop.trf.xlu1 }
 0x1a0   :  { %2219 = vmatmul.mubr.msk.bf16.gmra.mxu1 %vm67_vm0, %v460_v38 }
 0x1a1   :  { %2222 = vmatprep.mubr.msk.bf16.mxu1 %vm67_vm0, %v461_v39  ;;  %v337_v42 = vpop.trf.xlu0 }
 0x1a3   :  { %v370_v43 = vpop.trf.xlu1 }
 0x1a4   :  { %v467_v60 = vpack.c.bf16 %v370_v43, %v369_v40 }
 0x1a5   :  { %v338_v45 = vpop.trf.xlu0 }
 0x1a6   :  { %v463_v47 = vpack.c.bf16 %v338_v45, %v337_v42 }
 0x1a7   :  { %v371_v48 = vpop.trf.xlu1 }
 0x1a8   :  { %2223 = vmatmul.mubr.msk.bf16.gmra.mxu1 %vm67_vm0, %v462_v46 }
 0x1a9   :  { %2226 = vmatprep.mubr.msk.bf16.mxu1 %vm67_vm0, %v463_v47  ;;  %v339_v50 = vpop.trf.xlu0 }
 0x1ab   :  { %v372_v51 = vpop.trf.xlu1 }
 0x1ac   :  { %v468_v0 = vpack.c.bf16 %v372_v51, %v371_v48 }
 0x1ad   :  { %v340_v52 = vpop.trf.xlu0 }
 0x1ae   :  { %v464_v53 = vpack.c.bf16 %v340_v52, %v339_v50 }
 0x1af   :  { %v429_v55 = vpop.trf.xlu1 }
 0x1b0   :  { %2227 = vmatmul.mubr.msk.bf16.gmra.mxu1 %vm67_vm0, %v464_v53 }
 0x1b1   :  { %2230 = vmatprep.mubr.msk.bf16.mxu1 %vm67_vm0, %v465_v54  ;;  %v397_v56 = vpop.trf.xlu0 }
 0x1b3   :  { %v430_v58 = vpop.trf.xlu1 }
 0x1b4   :  { %v473_v12 = vpack.c.bf16 %v430_v58, %v429_v55 }
 0x1b5   :  { %v398_v57 = vpop.trf.xlu0 }
 0x1b6   :  { %v469_v1 = vpack.c.bf16 %v398_v57, %v397_v56 }
 0x1b7   :  { %v431_v62 = vpop.trf.xlu1 }
 0x1b8   :  { %2231 = vmatmul.mubr.msk.bf16.gmra.mxu1 %vm67_vm0, %v466_v59 }
 0x1b9   :  { %2234 = vmatprep.mubr.msk.bf16.mxu1 %vm67_vm0, %v467_v60  ;;  %v399_v61 = vpop.trf.xlu0 }
 0x1bb   :  { %v432_v3 = vpop.trf.xlu1 }
 0x1bc   :  { %v474_v15 = vpack.c.bf16 %v432_v3, %v431_v62 }
 0x1bd   :  { %v400_v63 = vpop.trf.xlu0 }
 0x1be   :  { %v470_v5 = vpack.c.bf16 %v400_v63, %v399_v61 }
 0x1bf   :  { %v433_v7 = vpop.trf.xlu1 }
 0x1c0   :  { %2235 = vmatmul.mubr.msk.bf16.gmra.mxu1 %vm67_vm0, %v468_v0 }
 0x1c1   :  { %2238 = vmatprep.mubr.msk.bf16.mxu1 %vm67_vm0, %v469_v1  ;;  %v401_v2 = vpop.trf.xlu0 }
 0x1c3   :  { %v434_v10 = vpop.trf.xlu1 }
 0x1c4   :  { %v475_v14 = vpack.c.bf16 %v434_v10, %v433_v7 }
 0x1c5   :  { %v402_v4 = vpop.trf.xlu0 }
 0x1c6   :  { %v471_v6 = vpack.c.bf16 %v402_v4, %v401_v2 }
 0x1c7   :  { %v435_v13 = vpop.trf.xlu1 }
 0x1c8   :  { %2239 = vmatmul.mubr.msk.bf16.gmra.mxu1 %vm67_vm0, %v470_v5 }
 0x1c9   :  { %2242 = vmatprep.mubr.msk.bf16.mxu1 %vm67_vm0, %v471_v6  ;;  %v403_v8 = vpop.trf.xlu0 }
 0x1cb   :  { %v436_v16 = vpop.trf.xlu1 }
 0x1cc   :  { %v476_v17 = vpack.c.bf16 %v436_v16, %v435_v13 }
 0x1cd   :  { %v404_v9 = vpop.trf.xlu0 }
 0x1ce   :  { %v472_v11 = vpack.c.bf16 %v404_v9, %v403_v8 }
 0x1d0   :  { %2243 = vmatmul.mubr.msk.bf16.gmra.mxu1 %vm67_vm0, %v472_v11 }
 0x1d1   :  { %2246 = vmatprep.mubr.msk.bf16.mxu1 %vm67_vm0, %v473_v12 }
 0x1d8   :  { %2247 = vmatmul.mubr.msk.bf16.gmra.mxu1 %vm67_vm0, %v474_v15 }
 0x1d9   :  { %2250 = vmatprep.mubr.msk.bf16.mxu1 %vm67_vm0, %v475_v14 }
 0x1e0   :  { %2251 = vmatmul.mubr.msk.bf16.gmra.mxu1 %vm67_vm0, %v476_v17 }
 0x220   :  { %v2192_v18 = vpop.f32.mrf.mxu1 }
 0x221   :  { %v936_v23 = vmul.f32 0.2, %v2192_v18  ;;  %vm872_vm3 = vcmp.ge.f32.partialorder %v2192_v18, 0.0 }
 0x222   :  { %v615_v19 = vpop.f32.mrf.mxu1 }
 0x223   :  { %v934_v21 = vmul.f32 0.2, %v615_v19  ;;  %vm870_vm2 = vcmp.ge.f32.partialorder %v615_v19, 0.0  ;;  %v1000_v29 = vsel %vm872_vm3, %v2192_v18, %v936_v23 }
 0x224   :  { %v2193_v20 = vpop.f32.mrf.mxu1 }
 0x225   :  { %vm873_vm1 = vcmp.ge.f32.partialorder %v2193_v20, 0.0  ;;  %v937_v22 = vmul.f32 0.2, %v2193_v20  ;;  %v998_v27 = vsel %vm870_vm2, %v615_v19, %v934_v21 }
 0x226   :  { %v618_v24 = vpop.f32.mrf.mxu1 }
 0x227   :  { %vm871_vm4 = vcmp.ge.f32.partialorder %v618_v24, 0.0  ;;  %v935_v25 = vmul.f32 0.2, %v618_v24  ;;  %v1001_v26 = vsel %vm873_vm1, %v2193_v20, %v937_v22 }
 0x228   :  { %v1063_v31 = vpack.c.bf16 %v1001_v26, %v1000_v29 }
 0x229   :  { %v999_v28 = vsel %vm871_vm4, %v618_v24, %v935_v25 }
 0x22a   :  { %v1062_v30 = vpack.c.bf16 %v999_v28, %v998_v27 }
 0x22c   :  { %2270 = vmatprep.mubr.bf16.mxu0 %v1062_v30 }
 0x22d   :  { %2271 = vmatmul.mubr.bf16.vlgmr.msra.gmra.mxu0 %v1063_v31 }
 0x230   :  { %v2196_v32 = vpop.f32.mrf.mxu1 }
 0x231   :  { %v940_v37 = vmul.f32 0.2, %v2196_v32  ;;  %vm876_vm7 = vcmp.ge.f32.partialorder %v2196_v32, 0.0 }
 0x232   :  { %v631_v33 = vpop.f32.mrf.mxu1 }
 0x233   :  { %v938_v35 = vmul.f32 0.2, %v631_v33  ;;  %vm874_vm6 = vcmp.ge.f32.partialorder %v631_v33, 0.0  ;;  %v1004_v44 = vsel %vm876_vm7, %v2196_v32, %v940_v37 }
 0x234   :  { %v2197_v34 = vpop.f32.mrf.mxu1 }
 0x235   :  { %vm877_vm5 = vcmp.ge.f32.partialorder %v2197_v34, 0.0  ;;  %v941_v36 = vmul.f32 0.2, %v2197_v34  ;;  %v1002_v42 = vsel %vm874_vm6, %v631_v33, %v938_v35 }
 0x236   :  { %v634_v38 = vpop.f32.mrf.mxu1 }
 0x237   :  { %vm875_vm8 = vcmp.ge.f32.partialorder %v634_v38, 0.0  ;;  %v939_v39 = vmul.f32 0.2, %v634_v38  ;;  %v1005_v40 = vsel %vm877_vm5, %v2197_v34, %v941_v36 }
 0x238   :  { %v2200_v41 = vpop.f32.mrf.mxu1  ;;  %v1065_v47 = vpack.c.bf16 %v1005_v40, %v1004_v44 }
 0x239   :  { %v1003_v43 = vsel %vm875_vm8, %v634_v38, %v939_v39  ;;  %v944_v51 = vmul.f32 0.2, %v2200_v41  ;;  %vm880_vm11 = vcmp.ge.f32.partialorder %v2200_v41, 0.0 }
 0x23a   :  { %v647_v45 = vpop.f32.mrf.mxu1  ;;  %v1064_v46 = vpack.c.bf16 %v1003_v43, %v1002_v42 }
 0x23b   :  { %v942_v49 = vmul.f32 0.2, %v647_v45  ;;  %vm878_vm10 = vcmp.ge.f32.partialorder %v647_v45, 0.0  ;;  %v1008_v58 = vsel %vm880_vm11, %v2200_v41, %v944_v51 }
 0x23c   :  { %v2201_v48 = vpop.f32.mrf.mxu1  ;;  %2274 = vmatprep.mubr.bf16.mxu0 %v1064_v46 }
 0x23d   :  { %vm881_vm9 = vcmp.ge.f32.partialorder %v2201_v48, 0.0  ;;  %v945_v50 = vmul.f32 0.2, %v2201_v48  ;;  %2275 = vmatmul.mubr.bf16.gmra.mxu0 %v1065_v47  ;;  %v1006_v56 = vsel %vm878_vm10, %v647_v45, %v942_v49 }
 0x23e   :  { %v650_v52 = vpop.f32.mrf.mxu1 }
 0x23f   :  { %vm879_vm12 = vcmp.ge.f32.partialorder %v650_v52, 0.0  ;;  %v943_v53 = vmul.f32 0.2, %v650_v52  ;;  %v1009_v54 = vsel %vm881_vm9, %v2201_v48, %v945_v50 }
 0x240   :  { %v2204_v55 = vpop.f32.mrf.mxu1  ;;  %v1067_v61 = vpack.c.bf16 %v1009_v54, %v1008_v58 }
 0x241   :  { %v1007_v57 = vsel %vm879_vm12, %v650_v52, %v943_v53  ;;  %v948_v1 = vmul.f32 0.2, %v2204_v55  ;;  %vm884_vm15 = vcmp.ge.f32.partialorder %v2204_v55, 0.0 }
 0x242   :  { %v663_v59 = vpop.f32.mrf.mxu1  ;;  %v1066_v60 = vpack.c.bf16 %v1007_v57, %v1006_v56 }
 0x243   :  { %v946_v63 = vmul.f32 0.2, %v663_v59  ;;  %vm882_vm14 = vcmp.ge.f32.partialorder %v663_v59, 0.0  ;;  %v1012_v8 = vsel %vm884_vm15, %v2204_v55, %v948_v1 }
 0x244   :  { %v2205_v62 = vpop.f32.mrf.mxu1  ;;  %2278 = vmatprep.mubr.bf16.mxu0 %v1066_v60 }
 0x245   :  { %vm885_vm13 = vcmp.ge.f32.partialorder %v2205_v62, 0.0  ;;  %v949_v0 = vmul.f32 0.2, %v2205_v62  ;;  %2279 = vmatmul.mubr.bf16.gmra.mxu0 %v1067_v61  ;;  %v1010_v6 = vsel %vm882_vm14, %v663_v59, %v946_v63 }
 0x246   :  { %v666_v2 = vpop.f32.mrf.mxu1 }
 0x247   :  { %vm883_vm0 = vcmp.ge.f32.partialorder %v666_v2, 0.0  ;;  %v947_v3 = vmul.f32 0.2, %v666_v2  ;;  %v1013_v4 = vsel %vm885_vm13, %v2205_v62, %v949_v0 }
 0x248   :  { %v2208_v5 = vpop.f32.mrf.mxu1  ;;  %v1069_v11 = vpack.c.bf16 %v1013_v4, %v1012_v8 }
 0x249   :  { %v1011_v7 = vsel %vm883_vm0, %v666_v2, %v947_v3  ;;  %v952_v15 = vmul.f32 0.2, %v2208_v5  ;;  %vm888_vm3 = vcmp.ge.f32.partialorder %v2208_v5, 0.0 }
 0x24a   :  { %v679_v9 = vpop.f32.mrf.mxu1  ;;  %v1068_v10 = vpack.c.bf16 %v1011_v7, %v1010_v6 }
 0x24b   :  { %v950_v13 = vmul.f32 0.2, %v679_v9  ;;  %vm886_vm2 = vcmp.ge.f32.partialorder %v679_v9, 0.0  ;;  %v1016_v22 = vsel %vm888_vm3, %v2208_v5, %v952_v15 }
 0x24c   :  { %v2209_v12 = vpop.f32.mrf.mxu1  ;;  %2282 = vmatprep.mubr.bf16.mxu0 %v1068_v10 }
 0x24d   :  { %vm889_vm1 = vcmp.ge.f32.partialorder %v2209_v12, 0.0  ;;  %v953_v14 = vmul.f32 0.2, %v2209_v12  ;;  %2283 = vmatmul.mubr.bf16.gmra.mxu0 %v1069_v11  ;;  %v1014_v20 = vsel %vm886_vm2, %v679_v9, %v950_v13 }
 0x24e   :  { %v682_v16 = vpop.f32.mrf.mxu1 }
 0x24f   :  { %vm887_vm4 = vcmp.ge.f32.partialorder %v682_v16, 0.0  ;;  %v951_v17 = vmul.f32 0.2, %v682_v16  ;;  %v1017_v18 = vsel %vm889_vm1, %v2209_v12, %v953_v14 }
 0x250   :  { %v2212_v19 = vpop.f32.mrf.mxu1  ;;  %v1071_v25 = vpack.c.bf16 %v1017_v18, %v1016_v22 }
 0x251   :  { %v1015_v21 = vsel %vm887_vm4, %v682_v16, %v951_v17  ;;  %v956_v29 = vmul.f32 0.2, %v2212_v19  ;;  %vm892_vm7 = vcmp.ge.f32.partialorder %v2212_v19, 0.0 }
 0x252   :  { %v695_v23 = vpop.f32.mrf.mxu1  ;;  %v1070_v24 = vpack.c.bf16 %v1015_v21, %v1014_v20 }
 0x253   :  { %v954_v27 = vmul.f32 0.2, %v695_v23  ;;  %vm890_vm6 = vcmp.ge.f32.partialorder %v695_v23, 0.0  ;;  %v1020_v36 = vsel %vm892_vm7, %v2212_v19, %v956_v29 }
 0x254   :  { %v2213_v26 = vpop.f32.mrf.mxu1  ;;  %2286 = vmatprep.mubr.bf16.mxu0 %v1070_v24 }
 0x255   :  { %vm893_vm5 = vcmp.ge.f32.partialorder %v2213_v26, 0.0  ;;  %v957_v28 = vmul.f32 0.2, %v2213_v26  ;;  %2287 = vmatmul.mubr.bf16.gmra.mxu0 %v1071_v25  ;;  %v1018_v34 = vsel %vm890_vm6, %v695_v23, %v954_v27 }
 0x256   :  { %v698_v30 = vpop.f32.mrf.mxu1 }
 0x257   :  { %vm891_vm8 = vcmp.ge.f32.partialorder %v698_v30, 0.0  ;;  %v955_v31 = vmul.f32 0.2, %v698_v30  ;;  %v1021_v32 = vsel %vm893_vm5, %v2213_v26, %v957_v28 }
 0x258   :  { %v2216_v33 = vpop.f32.mrf.mxu1  ;;  %v1073_v39 = vpack.c.bf16 %v1021_v32, %v1020_v36 }
 0x259   :  { %v1019_v35 = vsel %vm891_vm8, %v698_v30, %v955_v31  ;;  %v960_v43 = vmul.f32 0.2, %v2216_v33  ;;  %vm896_vm11 = vcmp.ge.f32.partialorder %v2216_v33, 0.0 }
 0x25a   :  { %v711_v37 = vpop.f32.mrf.mxu1  ;;  %v1072_v38 = vpack.c.bf16 %v1019_v35, %v1018_v34 }
 0x25b   :  { %v958_v41 = vmul.f32 0.2, %v711_v37  ;;  %vm894_vm10 = vcmp.ge.f32.partialorder %v711_v37, 0.0  ;;  %v1024_v50 = vsel %vm896_vm11, %v2216_v33, %v960_v43 }
 0x25c   :  { %v2217_v40 = vpop.f32.mrf.mxu1  ;;  %2290 = vmatprep.mubr.bf16.mxu0 %v1072_v38 }
 0x25d   :  { %vm897_vm9 = vcmp.ge.f32.partialorder %v2217_v40, 0.0  ;;  %v961_v42 = vmul.f32 0.2, %v2217_v40  ;;  %2291 = vmatmul.mubr.bf16.gmra.mxu0 %v1073_v39  ;;  %v1022_v48 = vsel %vm894_vm10, %v711_v37, %v958_v41 }
 0x25e   :  { %v714_v44 = vpop.f32.mrf.mxu1 }
 0x25f   :  { %vm895_vm12 = vcmp.ge.f32.partialorder %v714_v44, 0.0  ;;  %v959_v45 = vmul.f32 0.2, %v714_v44  ;;  %v1025_v46 = vsel %vm897_vm9, %v2217_v40, %v961_v42 }
 0x260   :  { %v2220_v47 = vpop.f32.mrf.mxu1  ;;  %v1075_v53 = vpack.c.bf16 %v1025_v46, %v1024_v50 }
 0x261   :  { %v1023_v49 = vsel %vm895_vm12, %v714_v44, %v959_v45  ;;  %v964_v57 = vmul.f32 0.2, %v2220_v47  ;;  %vm900_vm15 = vcmp.ge.f32.partialorder %v2220_v47, 0.0 }
 0x262   :  { %v727_v51 = vpop.f32.mrf.mxu1  ;;  %v1074_v52 = vpack.c.bf16 %v1023_v49, %v1022_v48 }
 0x263   :  { %v962_v55 = vmul.f32 0.2, %v727_v51  ;;  %vm898_vm14 = vcmp.ge.f32.partialorder %v727_v51, 0.0  ;;  %v1028_v0 = vsel %vm900_vm15, %v2220_v47, %v964_v57 }
 0x264   :  { %v2221_v54 = vpop.f32.mrf.mxu1  ;;  %2294 = vmatprep.mubr.bf16.mxu0 %v1074_v52 }
 0x265   :  { %vm901_vm13 = vcmp.ge.f32.partialorder %v2221_v54, 0.0  ;;  %v965_v56 = vmul.f32 0.2, %v2221_v54  ;;  %2295 = vmatmul.mubr.bf16.gmra.mxu0 %v1075_v53  ;;  %v1026_v62 = vsel %vm898_vm14, %v727_v51, %v962_v55 }
 0x266   :  { %v730_v58 = vpop.f32.mrf.mxu1 }
 0x267   :  { %vm899_vm0 = vcmp.ge.f32.partialorder %v730_v58, 0.0  ;;  %v963_v59 = vmul.f32 0.2, %v730_v58  ;;  %v1029_v60 = vsel %vm901_vm13, %v2221_v54, %v965_v56 }
 0x268   :  { %v2224_v61 = vpop.f32.mrf.mxu1  ;;  %v1077_v3 = vpack.c.bf16 %v1029_v60, %v1028_v0 }
 0x269   :  { %v1027_v63 = vsel %vm899_vm0, %v730_v58, %v963_v59  ;;  %v968_v7 = vmul.f32 0.2, %v2224_v61  ;;  %vm904_vm3 = vcmp.ge.f32.partialorder %v2224_v61, 0.0 }
 0x26a   :  { %v743_v1 = vpop.f32.mrf.mxu1  ;;  %v1076_v2 = vpack.c.bf16 %v1027_v63, %v1026_v62 }
 0x26b   :  { %v966_v5 = vmul.f32 0.2, %v743_v1  ;;  %vm902_vm2 = vcmp.ge.f32.partialorder %v743_v1, 0.0  ;;  %v1032_v14 = vsel %vm904_vm3, %v2224_v61, %v968_v7 }
 0x26c   :  { %v2225_v4 = vpop.f32.mrf.mxu1  ;;  %2298 = vmatprep.mubr.bf16.mxu0 %v1076_v2 }
 0x26d   :  { %vm905_vm1 = vcmp.ge.f32.partialorder %v2225_v4, 0.0  ;;  %v969_v6 = vmul.f32 0.2, %v2225_v4  ;;  %2299 = vmatmul.mubr.bf16.gmra.mxu0 %v1077_v3  ;;  %v1030_v12 = vsel %vm902_vm2, %v743_v1, %v966_v5 }
 0x26e   :  { %v746_v8 = vpop.f32.mrf.mxu1 }
 0x26f   :  { %vm903_vm4 = vcmp.ge.f32.partialorder %v746_v8, 0.0  ;;  %v967_v9 = vmul.f32 0.2, %v746_v8  ;;  %v1033_v10 = vsel %vm905_vm1, %v2225_v4, %v969_v6 }
 0x270   :  { %v2228_v11 = vpop.f32.mrf.mxu1  ;;  %v1079_v17 = vpack.c.bf16 %v1033_v10, %v1032_v14 }
 0x271   :  { %v1031_v13 = vsel %vm903_vm4, %v746_v8, %v967_v9  ;;  %v972_v21 = vmul.f32 0.2, %v2228_v11  ;;  %vm908_vm7 = vcmp.ge.f32.partialorder %v2228_v11, 0.0 }
 0x272   :  { %v759_v15 = vpop.f32.mrf.mxu1  ;;  %v1078_v16 = vpack.c.bf16 %v1031_v13, %v1030_v12 }
 0x273   :  { %v970_v19 = vmul.f32 0.2, %v759_v15  ;;  %vm906_vm6 = vcmp.ge.f32.partialorder %v759_v15, 0.0  ;;  %v1036_v28 = vsel %vm908_vm7, %v2228_v11, %v972_v21 }
 0x274   :  { %v2229_v18 = vpop.f32.mrf.mxu1  ;;  %2302 = vmatprep.mubr.bf16.mxu0 %v1078_v16 }
 0x275   :  { %vm909_vm5 = vcmp.ge.f32.partialorder %v2229_v18, 0.0  ;;  %v973_v20 = vmul.f32 0.2, %v2229_v18  ;;  %2303 = vmatmul.mubr.bf16.gmra.mxu0 %v1079_v17  ;;  %v1034_v26 = vsel %vm906_vm6, %v759_v15, %v970_v19 }
 0x276   :  { %v762_v22 = vpop.f32.mrf.mxu1 }
 0x277   :  { %vm907_vm8 = vcmp.ge.f32.partialorder %v762_v22, 0.0  ;;  %v971_v23 = vmul.f32 0.2, %v762_v22  ;;  %v1037_v24 = vsel %vm909_vm5, %v2229_v18, %v973_v20 }
 0x278   :  { %v2232_v25 = vpop.f32.mrf.mxu1  ;;  %v1081_v31 = vpack.c.bf16 %v1037_v24, %v1036_v28 }
 0x279   :  { %v1035_v27 = vsel %vm907_vm8, %v762_v22, %v971_v23  ;;  %v976_v35 = vmul.f32 0.2, %v2232_v25  ;;  %vm912_vm11 = vcmp.ge.f32.partialorder %v2232_v25, 0.0 }
 0x27a   :  { %v775_v29 = vpop.f32.mrf.mxu1  ;;  %v1080_v30 = vpack.c.bf16 %v1035_v27, %v1034_v26 }
 0x27b   :  { %v974_v33 = vmul.f32 0.2, %v775_v29  ;;  %vm910_vm10 = vcmp.ge.f32.partialorder %v775_v29, 0.0  ;;  %v1040_v42 = vsel %vm912_vm11, %v2232_v25, %v976_v35 }
 0x27c   :  { %v2233_v32 = vpop.f32.mrf.mxu1  ;;  %2306 = vmatprep.mubr.bf16.mxu0 %v1080_v30 }
 0x27d   :  { %vm913_vm9 = vcmp.ge.f32.partialorder %v2233_v32, 0.0  ;;  %v977_v34 = vmul.f32 0.2, %v2233_v32  ;;  %2307 = vmatmul.mubr.bf16.gmra.mxu0 %v1081_v31  ;;  %v1038_v40 = vsel %vm910_vm10, %v775_v29, %v974_v33 }
 0x27e   :  { %v778_v36 = vpop.f32.mrf.mxu1 }
 0x27f   :  { %vm911_vm12 = vcmp.ge.f32.partialorder %v778_v36, 0.0  ;;  %v975_v37 = vmul.f32 0.2, %v778_v36  ;;  %v1041_v38 = vsel %vm913_vm9, %v2233_v32, %v977_v34 }
 0x280   :  { %v2236_v39 = vpop.f32.mrf.mxu1  ;;  %v1083_v45 = vpack.c.bf16 %v1041_v38, %v1040_v42 }
 0x281   :  { %v1039_v41 = vsel %vm911_vm12, %v778_v36, %v975_v37  ;;  %v980_v49 = vmul.f32 0.2, %v2236_v39  ;;  %vm916_vm15 = vcmp.ge.f32.partialorder %v2236_v39, 0.0 }
 0x282   :  { %v791_v43 = vpop.f32.mrf.mxu1  ;;  %v1082_v44 = vpack.c.bf16 %v1039_v41, %v1038_v40 }
 0x283   :  { %v978_v47 = vmul.f32 0.2, %v791_v43  ;;  %vm914_vm14 = vcmp.ge.f32.partialorder %v791_v43, 0.0  ;;  %v1044_v56 = vsel %vm916_vm15, %v2236_v39, %v980_v49 }
 0x284   :  { %v2237_v46 = vpop.f32.mrf.mxu1  ;;  %2310 = vmatprep.mubr.bf16.mxu0 %v1082_v44 }
 0x285   :  { %vm917_vm13 = vcmp.ge.f32.partialorder %v2237_v46, 0.0  ;;  %v981_v48 = vmul.f32 0.2, %v2237_v46  ;;  %2311 = vmatmul.mubr.bf16.gmra.mxu0 %v1083_v45  ;;  %v1042_v54 = vsel %vm914_vm14, %v791_v43, %v978_v47 }
 0x286   :  { %v794_v50 = vpop.f32.mrf.mxu1 }
 0x287   :  { %vm915_vm0 = vcmp.ge.f32.partialorder %v794_v50, 0.0  ;;  %v979_v51 = vmul.f32 0.2, %v794_v50  ;;  %v1045_v52 = vsel %vm917_vm13, %v2237_v46, %v981_v48 }
 0x288   :  { %v2240_v53 = vpop.f32.mrf.mxu1  ;;  %v1085_v59 = vpack.c.bf16 %v1045_v52, %v1044_v56 }
 0x289   :  { %v1043_v55 = vsel %vm915_vm0, %v794_v50, %v979_v51  ;;  %v984_v63 = vmul.f32 0.2, %v2240_v53  ;;  %vm920_vm3 = vcmp.ge.f32.partialorder %v2240_v53, 0.0  ;;  %v2540_v50 = vld [vmem:[%s2848_s4 + $0x18] sm:$0xff]   ;;  %v2541_v51 = vld [vmem:[%s2848_s4 + $0x10] sm:$0xff]  }
 0x28a   :  { %v807_v57 = vpop.f32.mrf.mxu1  ;;  %v1084_v58 = vpack.c.bf16 %v1043_v55, %v1042_v54  ;;  %2374 = vmatprep.subr.bf16.mxu1 %v2540_v50  ;;  %2334 = vmatprep.subr.bf16.mxu0 %v2540_v50 }
 0x28b   :  { %v982_v61 = vmul.f32 0.2, %v807_v57  ;;  %vm918_vm2 = vcmp.ge.f32.partialorder %v807_v57, 0.0  ;;  %v1048_v6 = vsel %vm920_vm3, %v2240_v53, %v984_v63  ;;  %2378 = vmatpush3.bf16.msra.mxu1 %v2540_v50  ;;  %2335 = vmatpush3.bf16.msra.mxu0 %v2540_v50 }
 0x28c   :  { %v2241_v60 = vpop.f32.mrf.mxu1  ;;  %2314 = vmatprep.mubr.bf16.mxu0 %v1084_v58  ;;  %2375 = vmatprep.subr.bf16.mxu1 %v2541_v51 }
 0x28d   :  { %vm921_vm1 = vcmp.ge.f32.partialorder %v2241_v60, 0.0  ;;  %v985_v62 = vmul.f32 0.2, %v2241_v60  ;;  %2315 = vmatmul.mubr.bf16.gmra.mxu0 %v1085_v59  ;;  %v1046_v4 = vsel %vm918_vm2, %v807_v57, %v982_v61  ;;  %2336 = vmatprep.subr.bf16.mxu0 %v2541_v51  ;;  %v2542_v61 = vld [vmem:[%s2848_s4 + $0x8] sm:$0xff]  }
 0x28e   :  { %v810_v0 = vpop.f32.mrf.mxu1 }
 0x28f   :  { %vm919_vm4 = vcmp.ge.f32.partialorder %v810_v0, 0.0  ;;  %v983_v1 = vmul.f32 0.2, %v810_v0  ;;  %v1049_v2 = vsel %vm921_vm1, %v2241_v60, %v985_v62  ;;  %2379 = vmatpush3.bf16.msra.mxu1 %v2541_v51  ;;  %2337 = vmatpush3.bf16.msra.mxu0 %v2541_v51  ;;  %vm1751_vm1 = vcmask 523264  }
 0x290   :  { %v2244_v3 = vpop.f32.mrf.mxu1  ;;  %v1087_v9 = vpack.c.bf16 %v1049_v2, %v1048_v6  ;;  %2376 = vmatprep.subr.bf16.mxu1 %v2542_v61  ;;  %2338 = vmatprep.subr.bf16.mxu0 %v2542_v61 }
 0x291   :  { %v1047_v5 = vsel %vm919_vm4, %v810_v0, %v983_v1  ;;  %v988_v13 = vmul.f32 0.2, %v2244_v3  ;;  %vm924_vm7 = vcmp.ge.f32.partialorder %v2244_v3, 0.0 }
 0x292   :  { %v823_v7 = vpop.f32.mrf.mxu1  ;;  %v1086_v8 = vpack.c.bf16 %v1047_v5, %v1046_v4 }
 0x293   :  { %v986_v11 = vmul.f32 0.2, %v823_v7  ;;  %vm922_vm6 = vcmp.ge.f32.partialorder %v823_v7, 0.0  ;;  %v1052_v20 = vsel %vm924_vm7, %v2244_v3, %v988_v13  ;;  %2380 = vmatpush3.bf16.msra.mxu1 %v2542_v61  ;;  %2339 = vmatpush3.bf16.msra.mxu0 %v2542_v61 }
 0x294   :  { %v2245_v10 = vpop.f32.mrf.mxu1  ;;  %2318 = vmatprep.mubr.bf16.mxu0 %v1086_v8 }
 0x295   :  { %vm925_vm5 = vcmp.ge.f32.partialorder %v2245_v10, 0.0  ;;  %v989_v12 = vmul.f32 0.2, %v2245_v10  ;;  %2319 = vmatmul.mubr.bf16.gmra.mxu0 %v1087_v9  ;;  %v1050_v18 = vsel %vm922_vm6, %v823_v7, %v986_v11 }
 0x296   :  { %v826_v14 = vpop.f32.mrf.mxu1 }
 0x297   :  { %vm923_vm8 = vcmp.ge.f32.partialorder %v826_v14, 0.0  ;;  %v987_v15 = vmul.f32 0.2, %v826_v14  ;;  %v1053_v16 = vsel %vm925_vm5, %v2245_v10, %v989_v12 }
 0x298   :  { %v2248_v17 = vpop.f32.mrf.mxu1  ;;  %v1089_v23 = vpack.c.bf16 %v1053_v16, %v1052_v20 }
 0x299   :  { %v1051_v19 = vsel %vm923_vm8, %v826_v14, %v987_v15  ;;  %v992_v27 = vmul.f32 0.2, %v2248_v17  ;;  %vm928_vm11 = vcmp.ge.f32.partialorder %v2248_v17, 0.0  ;;  %v2543_v15 = vld [vmem:[%s2848_s4] sm:$0xff]  }
 0x29a   :  { %v839_v21 = vpop.f32.mrf.mxu1  ;;  %v1088_v22 = vpack.c.bf16 %v1051_v19, %v1050_v18  ;;  %2377 = vmatprep.subr.bf16.mxu1 %v2543_v15  ;;  %2340 = vmatprep.subr.bf16.mxu0 %v2543_v15 }
 0x29b   :  { %v990_v25 = vmul.f32 0.2, %v839_v21  ;;  %vm926_vm10 = vcmp.ge.f32.partialorder %v839_v21, 0.0  ;;  %v1056_v34 = vsel %vm928_vm11, %v2248_v17, %v992_v27  ;;  %2381 = vmatpush3.bf16.msra.mxu1 %v2543_v15  ;;  %2341 = vmatpush3.bf16.msra.mxu0 %v2543_v15 }
 0x29c   :  { %v2249_v24 = vpop.f32.mrf.mxu1  ;;  %2322 = vmatprep.mubr.bf16.mxu0 %v1088_v22 }
 0x29d   :  { %vm929_vm9 = vcmp.ge.f32.partialorder %v2249_v24, 0.0  ;;  %v993_v26 = vmul.f32 0.2, %v2249_v24  ;;  %2323 = vmatmul.mubr.bf16.gmra.mxu0 %v1089_v23  ;;  %v1054_v32 = vsel %vm926_vm10, %v839_v21, %v990_v25 }
 0x29e   :  { %v842_v28 = vpop.f32.mrf.mxu1 }
 0x29f   :  { %vm927_vm12 = vcmp.ge.f32.partialorder %v842_v28, 0.0  ;;  %v991_v29 = vmul.f32 0.2, %v842_v28  ;;  %v1057_v30 = vsel %vm929_vm9, %v2249_v24, %v993_v26 }
 0x2a0   :  { %v2252_v31 = vpop.f32.mrf.mxu1  ;;  %v1091_v37 = vpack.c.bf16 %v1057_v30, %v1056_v34 }
 0x2a1   :  { %v1055_v33 = vsel %vm927_vm12, %v842_v28, %v991_v29  ;;  %v996_v41 = vmul.f32 0.2, %v2252_v31  ;;  %vm932_vm15 = vcmp.ge.f32.partialorder %v2252_v31, 0.0 }
 0x2a2   :  { %v855_v35 = vpop.f32.mrf.mxu1  ;;  %v1090_v36 = vpack.c.bf16 %v1055_v33, %v1054_v32 }
 0x2a3   :  { %v994_v39 = vmul.f32 0.2, %v855_v35  ;;  %vm930_vm14 = vcmp.ge.f32.partialorder %v855_v35, 0.0  ;;  %v1060_v47 = vsel %vm932_vm15, %v2252_v31, %v996_v41 }
 0x2a4   :  { %v2253_v38 = vpop.f32.mrf.mxu1  ;;  %2326 = vmatprep.mubr.bf16.mxu0 %v1090_v36 }
 0x2a5   :  { %vm933_vm13 = vcmp.ge.f32.partialorder %v2253_v38, 0.0  ;;  %v997_v40 = vmul.f32 0.2, %v2253_v38  ;;  %2327 = vmatmul.mubr.bf16.gmra.mxu0 %v1091_v37  ;;  %v1058_v45 = vsel %vm930_vm14, %v855_v35, %v994_v39 }
 0x2a6   :  { %v858_v42 = vpop.f32.mrf.mxu1 }
 0x2a7   :  { %vm931_vm0 = vcmp.ge.f32.partialorder %v858_v42, 0.0  ;;  %v995_v43 = vmul.f32 0.2, %v858_v42  ;;  %v1061_v44 = vsel %vm933_vm13, %v2253_v38, %v997_v40 }
 0x2a8   :  { %v1093_v49 = vpack.c.bf16 %v1061_v44, %v1060_v47 }
 0x2a9   :  { %v1059_v46 = vsel %vm931_vm0, %v858_v42, %v995_v43 }
 0x2aa   :  { %v1092_v48 = vpack.c.bf16 %v1059_v46, %v1058_v45 }
 0x2ac   :  { %2330 = vmatprep.mubr.bf16.mxu0 %v1092_v48 }
 0x2ad   :  { %2331 = vmatmul.mubr.bf16.gmra.mxu0 %v1093_v49 }
 0x2ed   :  { %v2678_v52 = vpop.f32.mrf.mxu0 }
 0x2ef   :  { %v2680_v53 = vpop.f32.mrf.mxu0 }
 0x2f1   :  { %v2682_v54 = vpop.f32.mrf.mxu0 }
 0x2f3   :  { %v2684_v55 = vpop.f32.mrf.mxu0 }
 0x2fd   :  { %v2686_v56 = vpop.f32.mrf.mxu0 }
 0x2ff   :  { %v2688_v57 = vpop.f32.mrf.mxu0 }
 0x301   :  { %v2690_v58 = vpop.f32.mrf.mxu0 }
 0x303   :  { %v2692_v59 = vpop.f32.mrf.mxu0 }
 0x305   :  { %v2694_v60 = vpop.f32.mrf.mxu0 }
 0x307   :  { %v2699_v62 = vpop.f32.mrf.mxu0 }
 0x309   :  { %v2701_v63 = vpop.f32.mrf.mxu0 }
 0x30b   :  { %v2703_v0 = vpop.f32.mrf.mxu0 }
 0x30d   :  { %v2705_v1 = vpop.f32.mrf.mxu0 }
 0x30f   :  { %v2707_v2 = vpop.f32.mrf.mxu0 }
 0x311   :  { %v2709_v3 = vpop.f32.mrf.mxu0 }
 0x313   :  { %v2711_v4 = vpop.f32.mrf.mxu0 }
 0x315   :  { %v2288_v5 = vpop.f32.mrf.mxu0 }
 0x317   :  { %v1256_v6 = vpop.f32.mrf.mxu0 }
 0x319   :  { %v2289_v7 = vpop.f32.mrf.mxu0 }
 0x31b   :  { %v1259_v8 = vpop.f32.mrf.mxu0 }
 0x31d   :  { %v2292_v9 = vpop.f32.mrf.mxu0 }
 0x31f   :  { %v1272_v10 = vpop.f32.mrf.mxu0 }
 0x321   :  { %v2293_v11 = vpop.f32.mrf.mxu0 }
 0x323   :  { %v1275_v12 = vpop.f32.mrf.mxu0 }
 0x325   :  { %v2296_v13 = vpop.f32.mrf.mxu0 }
 0x326   :  { %v2390_v22 = vpack.i.bf16 %v2296_v13, %v2288_v5 }
 0x327   :  { %v1288_v14 = vpop.f32.mrf.mxu0 }
 0x328   :  { %v2386_v16 = vpack.i.bf16 %v1288_v14, %v1256_v6 }
 0x329   :  { %v2297_v17 = vpop.f32.mrf.mxu0 }
 0x32a   :  { %2387 = vxpose.xlu0.b32.start [1/8] (short) (narrow) %v2386_v16, 32  ;;  %v2392_v25 = vpack.i.bf16 %v2297_v17, %v2289_v7 }
 0x32b   :  { %v1291_v18 = vpop.f32.mrf.mxu0 }
 0x32c   :  { %v2388_v19 = vpack.i.bf16 %v1291_v18, %v1259_v8 }
 0x32d   :  { %v2300_v20 = vpop.f32.mrf.mxu0 }
 0x32e   :  { %2389 = vxpose.xlu0.b32.cont [2/8] (short) (narrow) %v2388_v19, 32  ;;  %v2398_v34 = vpack.i.bf16 %v2300_v20, %v2292_v9 }
 0x32f   :  { %v1304_v21 = vpop.f32.mrf.mxu0 }
 0x330   :  { %v2394_v28 = vpack.i.bf16 %v1304_v21, %v1272_v10 }
 0x331   :  { %v2301_v23 = vpop.f32.mrf.mxu0 }
 0x332   :  { %2391 = vxpose.xlu0.b32.cont [3/8] (short) (narrow) %v2390_v22, 32  ;;  %v2400_v37 = vpack.i.bf16 %v2301_v23, %v2293_v11 }
 0x333   :  { %v1307_v24 = vpop.f32.mrf.mxu0 }
 0x334   :  { %v2396_v31 = vpack.i.bf16 %v1307_v24, %v1275_v12 }
 0x335   :  { %v2304_v26 = vpop.f32.mrf.mxu0 }
 0x336   :  { %2393 = vxpose.xlu0.b32.cont [4/8] (short) (narrow) %v2392_v25, 32 }
 0x337   :  { %v1320_v27 = vpop.f32.mrf.mxu0 }
 0x339   :  { %v2305_v29 = vpop.f32.mrf.mxu0 }
 0x33a   :  { %2395 = vxpose.xlu0.b32.cont [5/8] (short) (narrow) %v2394_v28, 32 }
 0x33b   :  { %v1323_v30 = vpop.f32.mrf.mxu0 }
 0x33d   :  { %v2308_v32 = vpop.f32.mrf.mxu0 }
 0x33e   :  { %2397 = vxpose.xlu0.b32.cont [6/8] (short) (narrow) %v2396_v31, 32 }
 0x33f   :  { %v1336_v33 = vpop.f32.mrf.mxu0 }
 0x341   :  { %v2309_v35 = vpop.f32.mrf.mxu0 }
 0x342   :  { %2399 = vxpose.xlu0.b32.cont [7/8] (short) (narrow) %v2398_v34, 32 }
 0x343   :  { %v1339_v36 = vpop.f32.mrf.mxu0 }
 0x345   :  { %v2312_v38 = vpop.f32.mrf.mxu0 }
 0x346   :  { %2401 = vxpose.xlu0.b32.end [8/8] (short) (narrow) %v2400_v37, 32  ;;  %v2426_v46 = vpack.i.bf16 %v2312_v38, %v2304_v26 }
 0x347   :  { %v1352_v39 = vpop.f32.mrf.mxu0 }
 0x348   :  { %v2422_v40 = vpack.i.bf16 %v1352_v39, %v1320_v27 }
 0x349   :  { %v2313_v41 = vpop.f32.mrf.mxu0 }
 0x34a   :  { %2423 = vxpose.xlu1.b32.start [1/8] (short) (narrow) %v2422_v40, 32  ;;  %v2428_v49 = vpack.i.bf16 %v2313_v41, %v2305_v29 }
 0x34b   :  { %v1355_v42 = vpop.f32.mrf.mxu0 }
 0x34c   :  { %v2424_v43 = vpack.i.bf16 %v1355_v42, %v1323_v30 }
 0x34d   :  { %v2316_v44 = vpop.f32.mrf.mxu0 }
 0x34e   :  { %2425 = vxpose.xlu1.b32.cont [2/8] (short) (narrow) %v2424_v43, 32  ;;  %v2434_v12 = vpack.i.bf16 %v2316_v44, %v2308_v32 }
 0x34f   :  { %v1368_v45 = vpop.f32.mrf.mxu0 }
 0x350   :  { %v2430_v61 = vpack.i.bf16 %v1368_v45, %v1336_v33 }
 0x351   :  { %v2317_v47 = vpop.f32.mrf.mxu0 }
 0x352   :  { %2427 = vxpose.xlu1.b32.cont [3/8] (short) (narrow) %v2426_v46, 32  ;;  %v2436_v16 = vpack.i.bf16 %v2317_v47, %v2309_v35 }
 0x353   :  { %v1371_v48 = vpop.f32.mrf.mxu0 }
 0x354   :  { %v2432_v8 = vpack.i.bf16 %v1371_v48, %v1339_v36 }
 0x355   :  { %v2320_v50 = vpop.f32.mrf.mxu0 }
 0x356   :  { %2429 = vxpose.xlu1.b32.cont [4/8] (short) (narrow) %v2428_v49, 32  ;;  %v2462_v13 = vpack.i.bf16 %v2320_v50, %v2678_v52 }
 0x357   :  { %v1384_v51 = vpop.f32.mrf.mxu0 }
 0x358   :  { %v2458_v5 = vpack.i.bf16 %v1384_v51, %v2680_v53 }
 0x359   :  { %v2321_v6 = vpop.f32.mrf.mxu0 }
 0x35a   :  { %2431 = vxpose.xlu1.b32.cont [5/8] (short) (narrow) %v2430_v61, 32  ;;  %2459 = vxpose.xlu0.b32.start [1/8] (short) (narrow) %v2458_v5, 32  ;;  %v2464_v53 = vpack.i.bf16 %v2321_v6, %v2682_v54 }
 0x35b   :  { %v1387_v7 = vpop.f32.mrf.mxu0 }
 0x35c   :  { %v2460_v9 = vpack.i.bf16 %v1387_v7, %v2684_v55 }
 0x35d   :  { %v2324_v10 = vpop.f32.mrf.mxu0 }
 0x35e   :  { %2433 = vxpose.xlu1.b32.cont [6/8] (short) (narrow) %v2432_v8, 32  ;;  %2461 = vxpose.xlu0.b32.cont [2/8] (short) (narrow) %v2460_v9, 32  ;;  %v2470_v54 = vpack.i.bf16 %v2324_v10, %v2686_v56 }
 0x35f   :  { %v1400_v11 = vpop.f32.mrf.mxu0 }
 0x360   :  { %v2466_v55 = vpack.i.bf16 %v1400_v11, %v2688_v57 }
 0x361   :  { %v2325_v14 = vpop.f32.mrf.mxu0 }
 0x362   :  { %2435 = vxpose.xlu1.b32.cont [7/8] (short) (narrow) %v2434_v12, 32  ;;  %2463 = vxpose.xlu0.b32.cont [3/8] (short) (narrow) %v2462_v13, 32  ;;  %v2472_v57 = vpack.i.bf16 %v2325_v14, %v2690_v58 }
 0x363   :  { %v1403_v15 = vpop.f32.mrf.mxu0 }
 0x364   :  { %v2468_v52 = vpack.i.bf16 %v1403_v15, %v2692_v59 }
 0x365   :  { %v2328_v17 = vpop.f32.mrf.mxu0 }
 0x366   :  { %2437 = vxpose.xlu1.b32.end [8/8] (short) (narrow) %v2436_v16, 32  ;;  %2465 = vxpose.xlu0.b32.cont [4/8] (short) (narrow) %v2464_v53, 32  ;;  %v2498_v24 = vpack.i.bf16 %v2328_v17, %v2694_v60 }
 0x367   :  { %v1416_v18 = vpop.f32.mrf.mxu0 }
 0x368   :  { %v2494_v19 = vpack.i.bf16 %v1416_v18, %v2699_v62 }
 0x369   :  { %v2329_v20 = vpop.f32.mrf.mxu0 }
 0x36a   :  { %2467 = vxpose.xlu0.b32.cont [5/8] (short) (narrow) %v2466_v55, 32  ;;  %2495 = vxpose.xlu1.b32.start [1/8] (short) (narrow) %v2494_v19, 32  ;;  %v2500_v62 = vpack.i.bf16 %v2329_v20, %v2701_v63 }
 0x36b   :  { %v1419_v21 = vpop.f32.mrf.mxu0 }
 0x36c   :  { %v2496_v22 = vpack.i.bf16 %v1419_v21, %v2703_v0 }
 0x36d   :  { %v2332_v23 = vpop.f32.mrf.mxu0 }
 0x36e   :  { %2469 = vxpose.xlu0.b32.cont [6/8] (short) (narrow) %v2468_v52, 32  ;;  %2497 = vxpose.xlu1.b32.cont [2/8] (short) (narrow) %v2496_v22, 32  ;;  %v2506_v56 = vpack.i.bf16 %v2332_v23, %v2705_v1 }
 0x36f   :  { %v1432_v25 = vpop.f32.mrf.mxu0 }
 0x370   :  { %v2502_v59 = vpack.i.bf16 %v1432_v25, %v2707_v2 }
 0x371   :  { %v2333_v26 = vpop.f32.mrf.mxu0 }
 0x372   :  { %2471 = vxpose.xlu0.b32.cont [7/8] (short) (narrow) %v2470_v54, 32  ;;  %2499 = vxpose.xlu1.b32.cont [3/8] (short) (narrow) %v2498_v24, 32  ;;  %v2508_v60 = vpack.i.bf16 %v2333_v26, %v2709_v3 }
 0x373   :  { %v1435_v0 = vpop.f32.mrf.mxu0 }
 0x374   :  { %v2504_v27 = vpack.i.bf16 %v1435_v0, %v2711_v4 }
 0x376   :  { %2473 = vxpose.xlu0.b32.end [8/8] (short) (narrow) %v2472_v57, 32  ;;  %2501 = vxpose.xlu1.b32.cont [4/8] (short) (narrow) %v2500_v62, 32 }
 0x37a   :  { %2503 = vxpose.xlu1.b32.cont [5/8] (short) (narrow) %v2502_v59, 32 }
 0x37e   :  { %2505 = vxpose.xlu1.b32.cont [6/8] (short) (narrow) %v2504_v27, 32 }
 0x382   :  { %2507 = vxpose.xlu1.b32.cont [7/8] (short) (narrow) %v2506_v56, 32 }
 0x386   :  { %2509 = vxpose.xlu1.b32.end [8/8] (short) (narrow) %v2508_v60, 32 }
 0x3a6   :  { %v2402_v28 = vpop.trf.xlu0 }
 0x3a7   :  { %v2403_v58 = vunpack.i.l.bf16 %v2402_v28  ;;  %v2406_v2 = vunpack.i.h.bf16 %v2402_v28 }
 0x3aa   :  { %v2407_v29 = vpop.trf.xlu0 }
 0x3ab   :  { %v2408_v63 = vunpack.i.l.bf16 %v2407_v29  ;;  %v2411_v32 = vunpack.i.h.bf16 %v2407_v29 }
 0x3ad   :  { %v1707_v30 = vpack.c.bf16 %v2408_v63, %v2403_v58  ;;  %v1709_v35 = vpack.c.bf16 %v2411_v32, %v2406_v2 }
 0x3ae   :  { %v2412_v31 = vpop.trf.xlu0 }
 0x3af   :  { %2350 = vmatprep.mubr.msk.bf16.mxu1 %vm1751_vm1, %v1707_v30  ;;  %v2413_v33 = vunpack.i.l.bf16 %v2412_v31  ;;  %v2416_v36 = vunpack.i.h.bf16 %v2412_v31 }
 0x3b2   :  { %v2417_v4 = vpop.trf.xlu0 }
 0x3b3   :  { %v2418_v34 = vunpack.i.l.bf16 %v2417_v4  ;;  %v2421_v37 = vunpack.i.h.bf16 %v2417_v4 }
 0x3b5   :  { %v1708_v1 = vpack.c.bf16 %v2418_v34, %v2413_v33  ;;  %v1710_v3 = vpack.c.bf16 %v2421_v37, %v2416_v36 }
 0x3b7   :  { %2351 = vmatmul.mubr.msk.bf16.vlgmr.msra.gmra.mxu1 %vm1751_vm1, %v1708_v1 }
 0x3b8   :  { %2354 = vmatprep.mubr.msk.bf16.mxu1 %vm1751_vm1, %v1709_v35 }
 0x3bf   :  { %2355 = vmatmul.mubr.msk.bf16.gmra.mxu1 %vm1751_vm1, %v1710_v3 }
 0x3c6   :  { %v2438_v38 = vpop.trf.xlu1 }
 0x3c7   :  { %v2439_v39 = vunpack.i.l.bf16 %v2438_v38  ;;  %v2442_v45 = vunpack.i.h.bf16 %v2438_v38 }
 0x3ca   :  { %v2443_v40 = vpop.trf.xlu1 }
 0x3cb   :  { %v2444_v41 = vunpack.i.l.bf16 %v2443_v40  ;;  %v2447_v46 = vunpack.i.h.bf16 %v2443_v40 }
 0x3cd   :  { %v1711_v42 = vpack.c.bf16 %v2444_v41, %v2439_v39  ;;  %v1713_v51 = vpack.c.bf16 %v2447_v46, %v2442_v45 }
 0x3ce   :  { %v2448_v43 = vpop.trf.xlu1 }
 0x3cf   :  { %2358 = vmatprep.mubr.msk.bf16.mxu1 %vm1751_vm1, %v1711_v42  ;;  %v2449_v44 = vunpack.i.l.bf16 %v2448_v43  ;;  %v2452_v61 = vunpack.i.h.bf16 %v2448_v43 }
 0x3d2   :  { %v2453_v47 = vpop.trf.xlu1 }
 0x3d3   :  { %v2454_v48 = vunpack.i.l.bf16 %v2453_v47  ;;  %v2457_v5 = vunpack.i.h.bf16 %v2453_v47 }
 0x3d5   :  { %v1712_v49 = vpack.c.bf16 %v2454_v48, %v2449_v44  ;;  %v1714_v11 = vpack.c.bf16 %v2457_v5, %v2452_v61 }
 0x3d6   :  { %v2474_v50 = vpop.trf.xlu0 }
 0x3d7   :  { %2359 = vmatmul.mubr.msk.bf16.gmra.mxu1 %vm1751_vm1, %v1712_v49  ;;  %v2478_v6 = vunpack.i.h.bf16 %v2474_v50  ;;  %v2475_v7 = vunpack.i.l.bf16 %v2474_v50 }
 0x3d8   :  { %2362 = vmatprep.mubr.msk.bf16.mxu1 %vm1751_vm1, %v1713_v51 }
 0x3da   :  { %v2479_v8 = vpop.trf.xlu0 }
 0x3db   :  { %v2483_v9 = vunpack.i.h.bf16 %v2479_v8  ;;  %v2480_v10 = vunpack.i.l.bf16 %v2479_v8 }
 0x3dd   :  { %v1703_v12 = vpack.c.bf16 %v2480_v10, %v2475_v7  ;;  %v1715_v13 = vpack.c.bf16 %v2483_v9, %v2478_v6 }
 0x3de   :  { %v2484_v14 = vpop.trf.xlu0 }
 0x3df   :  { %2363 = vmatmul.mubr.msk.bf16.gmra.mxu1 %vm1751_vm1, %v1714_v11  ;;  %2342 = vmatprep.mubr.msk.bf16.mxu0 %vm1751_vm1, %v1703_v12  ;;  %v2488_v15 = vunpack.i.h.bf16 %v2484_v14  ;;  %v2485_v16 = vunpack.i.l.bf16 %v2484_v14 }
 0x3e0   :  { %2366 = vmatprep.mubr.msk.bf16.mxu1 %vm1751_vm1, %v1715_v13 }
 0x3e2   :  { %v2489_v53 = vpop.trf.xlu0 }
 0x3e3   :  { %v2493_v17 = vunpack.i.h.bf16 %v2489_v53  ;;  %v2490_v18 = vunpack.i.l.bf16 %v2489_v53 }
 0x3e5   :  { %v1704_v55 = vpack.c.bf16 %v2490_v18, %v2485_v16  ;;  %v1716_v19 = vpack.c.bf16 %v2493_v17, %v2488_v15 }
 0x3e6   :  { %v2510_v20 = vpop.trf.xlu1 }
 0x3e7   :  { %2343 = vmatmul.mubr.msk.bf16.vlgmr.msra.gmra.mxu0 %vm1751_vm1, %v1704_v55  ;;  %2367 = vmatmul.mubr.msk.bf16.gmra.mxu1 %vm1751_vm1, %v1716_v19  ;;  %v2514_v21 = vunpack.i.h.bf16 %v2510_v20  ;;  %v2511_v52 = vunpack.i.l.bf16 %v2510_v20 }
 0x3ea   :  { %v2515_v22 = vpop.trf.xlu1 }
 0x3eb   :  { %v2519_v23 = vunpack.i.h.bf16 %v2515_v22  ;;  %v2516_v54 = vunpack.i.l.bf16 %v2515_v22 }
 0x3ed   :  { %v1705_v24 = vpack.c.bf16 %v2516_v54, %v2511_v52  ;;  %v1717_v25 = vpack.c.bf16 %v2519_v23, %v2514_v21 }
 0x3ee   :  { %v2520_v57 = vpop.trf.xlu1 }
 0x3ef   :  { %2346 = vmatprep.mubr.msk.bf16.mxu0 %vm1751_vm1, %v1705_v24  ;;  %2370 = vmatprep.mubr.msk.bf16.mxu1 %vm1751_vm1, %v1717_v25  ;;  %v2524_v62 = vunpack.i.h.bf16 %v2520_v57  ;;  %v2521_v26 = vunpack.i.l.bf16 %v2520_v57 }
 0x3f2   :  { %v2525_v59 = vpop.trf.xlu1 }
 0x3f3   :  { %v2529_v0 = vunpack.i.h.bf16 %v2525_v59  ;;  %v2526_v27 = vunpack.i.l.bf16 %v2525_v59 }
 0x3f5   :  { %v1706_v56 = vpack.c.bf16 %v2526_v27, %v2521_v26  ;;  %v1718_v60 = vpack.c.bf16 %v2529_v0, %v2524_v62 }
 0x3f7   :  { %2347 = vmatmul.mubr.msk.bf16.gmra.mxu0 %vm1751_vm1, %v1706_v56  ;;  %2371 = vmatmul.mubr.msk.bf16.gmra.mxu1 %vm1751_vm1, %v1718_v60 }
 0x477   :  { %v2352_v28 = vpop.f32.mrf.mxu1 }
 0x478   :  { %1971 = vst [vmem:[%s2849_s5 + $0x50] sm:$0xff] %v2352_v28 }
 0x479   :  { %v1866_v58 = vpop.f32.mrf.mxu1 }
 0x47a   :  { %1969 = vst [vmem:[%s2849_s5 + $0x40] sm:$0xff] %v1866_v58 }
 0x47b   :  { %v2353_v29 = vpop.f32.mrf.mxu1 }
 0x47c   :  { %1972 = vst [vmem:[%s2849_s5 + $0x58] sm:$0xf] %v2353_v29 }
 0x47d   :  { %v1869_v63 = vpop.f32.mrf.mxu1 }
 0x47e   :  { %1970 = vst [vmem:[%s2849_s5 + $0x48] sm:$0xff] %v1869_v63 }
 0x47f   :  { %v2356_v30 = vpop.f32.mrf.mxu1 }
 0x480   :  { %1975 = vst [vmem:[%s2849_s5 + $0x70] sm:$0xff] %v2356_v30 }
 0x481   :  { %v1882_v31 = vpop.f32.mrf.mxu1 }
 0x482   :  { %1973 = vst [vmem:[%s2849_s5 + $0x60] sm:$0xff] %v1882_v31 }
 0x483   :  { %v2357_v2 = vpop.f32.mrf.mxu1 }
 0x484   :  { %1976 = vst [vmem:[%s2849_s5 + $0x78] sm:$0xf] %v2357_v2 }
 0x485   :  { %v1885_v32 = vpop.f32.mrf.mxu1 }
 0x486   :  { %1974 = vst [vmem:[%s2849_s5 + $0x68] sm:$0xff] %v1885_v32 }
 0x497   :  { %v2360_v33 = vpop.f32.mrf.mxu1 }
 0x498   :  { %1979 = vst [vmem:[%s2849_s5 + $0x90] sm:$0xff] %v2360_v33 }
 0x499   :  { %v1898_v4 = vpop.f32.mrf.mxu1 }
 0x49a   :  { %1977 = vst [vmem:[%s2849_s5 + $0x80] sm:$0xff] %v1898_v4 }
 0x49b   :  { %v2361_v34 = vpop.f32.mrf.mxu1 }
 0x49c   :  { %1980 = vst [vmem:[%s2849_s5 + $0x98] sm:$0xf] %v2361_v34 }
 0x49d   :  { %v1901_v35 = vpop.f32.mrf.mxu1 }
 0x49e   :  { %1978 = vst [vmem:[%s2849_s5 + $0x88] sm:$0xff] %v1901_v35 }
 0x49f   :  { %v2364_v1 = vpop.f32.mrf.mxu1 }
 0x4a0   :  { %1983 = vst [vmem:[%s2849_s5 + $0xb0] sm:$0xff] %v2364_v1 }
 0x4a1   :  { %v1914_v36 = vpop.f32.mrf.mxu1 }
 0x4a2   :  { %1981 = vst [vmem:[%s2849_s5 + $0xa0] sm:$0xff] %v1914_v36 }
 0x4a3   :  { %v2365_v37 = vpop.f32.mrf.mxu1 }
 0x4a4   :  { %1984 = vst [vmem:[%s2849_s5 + $0xb8] sm:$0xf] %v2365_v37 }
 0x4a5   :  { %v1917_v3 = vpop.f32.mrf.mxu1 }
 0x4a6   :  { %1982 = vst [vmem:[%s2849_s5 + $0xa8] sm:$0xff] %v1917_v3 }
 0x4a7   :  { %v2344_v38 = vpop.f32.mrf.mxu0  ;;  %v2368_v39 = vpop.f32.mrf.mxu1 }
 0x4a8   :  { %1963 = vst [vmem:[%s2849_s5 + $0x10] sm:$0xff] %v2344_v38  ;;  %1987 = vst [vmem:[%s2849_s5 + $0xd0] sm:$0xff] %v2368_v39 }
 0x4a9   :  { %v1834_v40 = vpop.f32.mrf.mxu0  ;;  %v1930_v41 = vpop.f32.mrf.mxu1 }
 0x4aa   :  { %1961 = vst [vmem:[%s2849_s5] sm:$0xff] %v1834_v40  ;;  %1985 = vst [vmem:[%s2849_s5 + $0xc0] sm:$0xff] %v1930_v41 }
 0x4ab   :  { %v2345_v42 = vpop.f32.mrf.mxu0  ;;  %v2369_v43 = vpop.f32.mrf.mxu1 }
 0x4ac   :  { %1964 = vst [vmem:[%s2849_s5 + $0x18] sm:$0xf] %v2345_v42  ;;  %1988 = vst [vmem:[%s2849_s5 + $0xd8] sm:$0xf] %v2369_v43 }
 0x4ad   :  { %v1837_v44 = vpop.f32.mrf.mxu0  ;;  %v1933_v45 = vpop.f32.mrf.mxu1 }
 0x4ae   :  { %1962 = vst [vmem:[%s2849_s5 + $0x8] sm:$0xff] %v1837_v44  ;;  %1986 = vst [vmem:[%s2849_s5 + $0xc8] sm:$0xff] %v1933_v45 }
 0x4b7   :  { %v2348_v46 = vpop.f32.mrf.mxu0  ;;  %v2372_v47 = vpop.f32.mrf.mxu1 }
 0x4b8   :  { %1967 = vst [vmem:[%s2849_s5 + $0x30] sm:$0xff] %v2348_v46  ;;  %1991 = vst [vmem:[%s2849_s5 + $0xf0] sm:$0xff] %v2372_v47 }
 0x4b9   :  { %v1850_v48 = vpop.f32.mrf.mxu0  ;;  %v1946_v49 = vpop.f32.mrf.mxu1 }
 0x4ba   :  { %1965 = vst [vmem:[%s2849_s5 + $0x20] sm:$0xff] %v1850_v48  ;;  %1989 = vst [vmem:[%s2849_s5 + $0xe0] sm:$0xff] %v1946_v49 }
 0x4bb   :  { %v2349_v50 = vpop.f32.mrf.mxu0  ;;  %v2373_v51 = vpop.f32.mrf.mxu1 }
 0x4bc   :  { %1968 = vst [vmem:[%s2849_s5 + $0x38] sm:$0xf] %v2349_v50  ;;  %1992 = vst [vmem:[%s2849_s5 + $0xf8] sm:$0xf] %v2373_v51 }
 0x4bd   :  { %v1853_v61 = vpop.f32.mrf.mxu0  ;;  %v1949_v5 = vpop.f32.mrf.mxu1 }
 0x4be   :  { %1966 = vst [vmem:[%s2849_s5 + $0x28] sm:$0xff] %v1853_v61  ;;  %1990 = vst [vmem:[%s2849_s5 + $0xe8] sm:$0xff] %v1949_v5 }
 0x4bf   :  { %1997 = vsyncpa [#allocation3], 1 }

</bundles_post_ra>
